<compile_context>
chip_gen: v6e
topology: v6e:2x2x1
jax: 0.10.0
libtpu: 0.0.40
codegen_flags: <defaults>
</compile_context>

<pallas_src>
import math

import jax
import jax.numpy as jnp
from jax.experimental import pallas as pl
from jax.experimental.pallas import tpu as pltpu

LN_EPS = 1e-5  # PyTorch nn.LayerNorm default


def _layer_norm(x, weight, bias):
    """Single-pass LayerNorm: one reduction pair, var = E[x^2] - mu^2."""
    inv_n = 1.0 / x.shape[-1]
    mu = jnp.sum(x, axis=-1, keepdims=True) * inv_n
    ms = jnp.sum(x * x, axis=-1, keepdims=True) * inv_n
    var = ms - mu * mu
    return (x - mu) * jax.lax.rsqrt(var + LN_EPS) * weight + bias


def _lstm_seq_kernel(
    x_ref,                      # (1, bb, I)   per-(batch-tile, time-step) block
    h0_ref, c0_ref,             # (bb, H)      initial state (read at t == 0)
    w_ref, b_ref,               # (I+H, 5H) bf16 fused weight, (1, 5H) f32 bias
    ln1_w_ref, ln1_b_ref,       # (1, H)       LayerNorm 1 (on c)
    ln2_w_ref, ln2_b_ref,       # (1, H)       LayerNorm 2 (on h)
    h_seq_ref,                  # (1, bb, H)   per-step output block
    c_last_ref,                 # (bb, H)      final cell state
    h_scr, c_scr,               # (bb, H) f32  VMEM carries across time steps
):
    t = pl.program_id(1)
    H = h0_ref.shape[-1]

    @pl.when(t == 0)
    def _():
        h_scr[...] = h0_ref[...].astype(jnp.float32)
        c_scr[...] = c0_ref[...].astype(jnp.float32)

    x = x_ref[0].astype(jnp.float32)           # (bb, I)
    h = h_scr[...]
    c = c_scr[...]

    # TODO(synk): dropout on [x, h] is identity here (eval mode only).
    xh = jnp.concatenate([x, h], axis=-1).astype(jnp.bfloat16)     # (bb, I+H)

    # Single fused MXU call: 4 gate blocks + residual projection columns.
    fused = jnp.dot(xh, w_ref[...], preferred_element_type=jnp.float32)
    fused = fused + b_ref[...].astype(jnp.float32)                  # (bb, 5H)

    i_t = jax.nn.sigmoid(fused[:, 0 * H:1 * H])
    f_t = jax.nn.sigmoid(fused[:, 1 * H:2 * H])
    g_t = jnp.tanh(fused[:, 2 * H:3 * H])
    o_t = jax.nn.sigmoid(fused[:, 3 * H:4 * H])
    resid = fused[:, 4 * H:5 * H]               # x @ Wr + br (h rows are zero)

    c_new = f_t * c + i_t * g_t
    c_new = _layer_norm(c_new,
                        ln1_w_ref[...].astype(jnp.float32),
                        ln1_b_ref[...].astype(jnp.float32))

    h_new = o_t * jnp.tanh(c_new)
    h_new = _layer_norm(h_new,
                        ln2_w_ref[...].astype(jnp.float32),
                        ln2_b_ref[...].astype(jnp.float32))
    h_new = h_new + resid

    h_scr[...] = h_new
    c_scr[...] = c_new
    h_seq_ref[0] = h_new.astype(h_seq_ref.dtype)

    @pl.when(t == pl.num_programs(1) - 1)
    def _():
        c_last_ref[...] = c_new.astype(c_last_ref.dtype)


def custom_lstm_sequence(x_seq, h0, c0, fused_params, *, batch_block=None):
    """Run CustomLSTMCell over a whole sequence inside ONE pallas_call.

    x_seq: (T, B, I);  h0, c0: (B, H).
    Returns (h_seq (T, B, H), c_last (B, H)).
    """
    T, B, I = x_seq.shape
    H = h0.shape[-1]
    w, b, ln1_w, ln1_b, ln2_w, ln2_b = fused_params
    assert w.shape == (I + H, 5 * H)

    bb = B if batch_block is None else batch_block
    assert B % bb == 0
    n_b = B // bb

    def const(shape):
        return pl.BlockSpec(shape, lambda bi, ti: tuple(0 for _ in shape))

    grid_spec = pltpu.PrefetchScalarGridSpec(
        num_scalar_prefetch=0,
        grid=(n_b, T),
        in_specs=[
            pl.BlockSpec((1, bb, I), lambda bi, ti: (ti, bi, 0)),   # x_t block
            pl.BlockSpec((bb, H), lambda bi, ti: (bi, 0)),          # h0
            pl.BlockSpec((bb, H), lambda bi, ti: (bi, 0)),          # c0
            const((I + H, 5 * H)),                                  # fused weight (bf16)
            const((1, 5 * H)),                                      # fused bias
            const((1, H)), const((1, H)),                           # LayerNorm 1
            const((1, H)), const((1, H)),                           # LayerNorm 2
        ],
        out_specs=(
            pl.BlockSpec((1, bb, H), lambda bi, ti: (ti, bi, 0)),   # h_seq
            pl.BlockSpec((bb, H), lambda bi, ti: (bi, 0)),          # c_last
        ),
        scratch_shapes=[
            pltpu.VMEM((bb, H), jnp.float32),   # h carry
            pltpu.VMEM((bb, H), jnp.float32),   # c carry
        ],
    )

    out_shape = (
        jax.ShapeDtypeStruct((T, B, H), x_seq.dtype),
        jax.ShapeDtypeStruct((B, H), x_seq.dtype),
    )

    return pl.pallas_call(
        _lstm_seq_kernel,
        out_shape=out_shape,
        grid_spec=grid_spec,
        compiler_params=pltpu.CompilerParams(
            # batch tiles are independent (v7x megacore); time is a sequential carry.
            dimension_semantics=("parallel", "arbitrary"),
        ),
    )(x_seq, h0, c0, w, b, ln1_w, ln1_b, ln2_w, ln2_b)


def custom_lstm_cell(x_t, h_t, c_t, fused_params):
    """Single-step forward, matching CustomLSTMCell.forward (eval mode)."""
    h_seq, c_last = custom_lstm_sequence(x_t[None], h_t, c_t, fused_params)
    return h_seq[0], c_last


def init_params(key, input_sz, hidden_sz, dtype=jnp.float32):
    """PyTorch-style init, fused into the kernel layout.

    Returns (w_fused bf16 (I+H, 5H), b_fused (1, 5H), ln1_w, ln1_b, ln2_w, ln2_b).
    Fused weight columns: [gates (4H) | residual_proj (H)]; the residual rows
    belonging to h are zero (the projection only sees x), so semantics match.
    """
    k_gw, k_gb, k_rw, k_rb = jax.random.split(key, 4)
    I, H = input_sz, hidden_sz

    # gates: nn.Linear(I+H, 4H): xavier_uniform_ weight, default uniform bias.
    fan_in, fan_out = I + H, 4 * H
    xav = math.sqrt(6.0 / (fan_in + fan_out))
    w_gates = jax.random.uniform(k_gw, (fan_in, fan_out), dtype, -xav, xav)
    b_bound = 1.0 / math.sqrt(fan_in)
    b_gates = jax.random.uniform(k_gb, (1, fan_out), dtype, -b_bound, b_bound)

    # LayerNorms: weight=1, bias=0.
    ln1_w = jnp.ones((1, H), dtype); ln1_b = jnp.zeros((1, H), dtype)
    ln2_w = jnp.ones((1, H), dtype); ln2_b = jnp.zeros((1, H), dtype)

    # residual_proj (present because I != H): nn.Linear(I, H) default init.
    r_bound = 1.0 / math.sqrt(I)
    w_res = jax.random.uniform(k_rw, (I, H), dtype, -r_bound, r_bound)
    b_res = jax.random.uniform(k_rb, (1, H), dtype, -r_bound, r_bound)

    w_res_full = jnp.concatenate([w_res, jnp.zeros((H, H), dtype)], axis=0)
    w_fused = jnp.concatenate([w_gates, w_res_full], axis=1)     # (I+H, 5H)
    b_fused = jnp.concatenate([b_gates, b_res], axis=1)          # (1, 5H)

    # bf16 weights: native MXU dtype, halves weight DMA bytes. Intentional
    # numerics change vs f32; the reference below uses the same bf16 weights.
    return (w_fused.astype(jnp.bfloat16), b_fused, ln1_w, ln1_b, ln2_w, ln2_b)


# ----------------------- pure-JAX references (same math) -----------------------

def reference_cell(x_t, h_t, c_t, fused_params):
    w, b, ln1_w, ln1_b, ln2_w, ln2_b = fused_params
    H = h_t.shape[-1]
    xh = jnp.concatenate([x_t, h_t], axis=-1).astype(jnp.bfloat16)
    fused = jnp.dot(xh, w, preferred_element_type=jnp.float32) + b.astype(jnp.float32)
    i_t = jax.nn.sigmoid(fused[:, 0 * H:1 * H])
    f_t = jax.nn.sigmoid(fused[:, 1 * H:2 * H])
    g_t = jnp.tanh(fused[:, 2 * H:3 * H])
    o_t = jax.nn.sigmoid(fused[:, 3 * H:4 * H])
    resid = fused[:, 4 * H:]
    c_new = _layer_norm(f_t * c_t + i_t * g_t, ln1_w, ln1_b)
    h_new = _layer_norm(o_t * jnp.tanh(c_new), ln2_w, ln2_b) + resid
    return h_new, c_new


def reference_sequence(x_seq, h0, c0, fused_params):
    def step(carry, x_t):
        h, c = carry
        h, c = reference_cell(x_t, h, c, fused_params)
        return (h, c), h
    (_, c_last), h_seq = jax.lax.scan(step, (h0, c0), x_seq)
    return h_seq, c_last


if __name__ == "__main__":
    # Lane-dense sizes: I and H multiples of 128 so gate slices / output stores
    # are full-vreg; I != H so the residual projection path is exercised.
    BATCH, INPUT_SZ, HIDDEN_SZ, SEQ_LEN = 8, 128, 256, 8

    key = jax.random.PRNGKey(0)
    k_p, k_x, k_h, k_c = jax.random.split(key, 4)

    params = init_params(k_p, INPUT_SZ, HIDDEN_SZ)
    x_seq = jax.random.normal(k_x, (SEQ_LEN, BATCH, INPUT_SZ), jnp.float32)
    h0 = jax.random.normal(k_h, (BATCH, HIDDEN_SZ), jnp.float32)
    c0 = jax.random.normal(k_c, (BATCH, HIDDEN_SZ), jnp.float32)

    # --- single-cell forward (matches CustomLSTMCell.forward, eval mode) ---
    h1, c1 = custom_lstm_cell(x_seq[0], h0, c0, params)
    jax.block_until_ready((h1, c1))
    h1_ref, c1_ref = reference_cell(x_seq[0], h0, c0, params)
    assert jnp.allclose(h1, h1_ref, atol=2e-3, rtol=2e-3)
    assert jnp.allclose(c1, c1_ref, atol=2e-3, rtol=2e-3)

    # --- full-sequence forward (time loop inside one pallas_call) ---
    h_seq, c_last = custom_lstm_sequence(x_seq, h0, c0, params)
    jax.block_until_ready((h_seq, c_last))
    h_seq_ref, c_last_ref = reference_sequence(x_seq, h0, c0, params)
    assert jnp.allclose(h_seq, h_seq_ref, atol=2e-3, rtol=2e-3)
    assert jnp.allclose(c_last, c_last_ref, atol=2e-3, rtol=2e-3)

    print("KERNEL_OK")
</pallas_src>

<mosaic_0001>
module attributes {stable_mosaic.version = 11 : i64} {
  func.func @_lstm_seq_kernel(%arg0: i32, %arg1: i32, %arg2: memref<1x8x128xf32, #tpu.memory_space<vmem>>, %arg3: memref<8x256xf32, #tpu.memory_space<vmem>>, %arg4: memref<8x256xf32, #tpu.memory_space<vmem>>, %arg5: memref<384x1280xbf16, #tpu.memory_space<vmem>>, %arg6: memref<1x1280xf32, #tpu.memory_space<vmem>>, %arg7: memref<1x256xf32, #tpu.memory_space<vmem>>, %arg8: memref<1x256xf32, #tpu.memory_space<vmem>>, %arg9: memref<1x256xf32, #tpu.memory_space<vmem>>, %arg10: memref<1x256xf32, #tpu.memory_space<vmem>>, %arg11: memref<1x8x256xf32, #tpu.memory_space<vmem>>, %arg12: memref<8x256xf32, #tpu.memory_space<vmem>>, %arg13: memref<8x256xf32, #tpu.memory_space<vmem>>, %arg14: memref<8x256xf32, #tpu.memory_space<vmem>>) attributes {dimension_semantics = [#tpu.dimension_semantics<parallel>, #tpu.dimension_semantics<arbitrary>], iteration_bounds = array<i64: 1, 1>, scalar_prefetch = 0 : i64, scratch_operands = 2 : i64, tpu.core_type = #tpu.core_type<tc>, window_params = [{transform_indices = @transform_0, window_bounds = array<i64: 1, 8, 128>}, {transform_indices = @transform_1, window_bounds = array<i64: 8, 256>}, {transform_indices = @transform_2, window_bounds = array<i64: 8, 256>}, {pipeline_mode = #tpu.pipeline_mode<synchronous>, transform_indices = @transform_3, window_bounds = array<i64: 384, 1280>}, {pipeline_mode = #tpu.pipeline_mode<synchronous>, transform_indices = @transform_4, window_bounds = array<i64: 1, 1280>}, {pipeline_mode = #tpu.pipeline_mode<synchronous>, transform_indices = @transform_5, window_bounds = array<i64: 1, 256>}, {pipeline_mode = #tpu.pipeline_mode<synchronous>, transform_indices = @transform_6, window_bounds = array<i64: 1, 256>}, {pipeline_mode = #tpu.pipeline_mode<synchronous>, transform_indices = @transform_7, window_bounds = array<i64: 1, 256>}, {pipeline_mode = #tpu.pipeline_mode<synchronous>, transform_indices = @transform_8, window_bounds = array<i64: 1, 256>}, {transform_indices = @transform_9, window_bounds = array<i64: 1, 8, 256>}, {transform_indices = @transform_10, window_bounds = array<i64: 8, 256>}]} {
    %c0_i32 = arith.constant 0 : i32
    %0 = arith.cmpi eq, %arg1, %c0_i32 : i32
    %1 = arith.extui %0 : i1 to i32
    %c0_i32_0 = arith.constant 0 : i32
    %2 = arith.cmpi ne, %1, %c0_i32_0 : i32
    scf.if %2 {
      %c0_41 = arith.constant 0 : index
      %c0_42 = arith.constant 0 : index
      %97 = vector.load %arg3[%c0_41, %c0_42] : memref<8x256xf32, #tpu.memory_space<vmem>>, vector<8x256xf32>
      %c0_43 = arith.constant 0 : index
      %c0_44 = arith.constant 0 : index
      %98 = vector.load %arg13[%c0_43, %c0_44] : memref<8x256xf32, #tpu.memory_space<vmem>>, vector<8x256xf32>
      tpu.vector_store %arg13[%c0_43, %c0_44], %97 {strides = array<i32>} : memref<8x256xf32, #tpu.memory_space<vmem>>, vector<8x256xf32>,
      %c0_45 = arith.constant 0 : index
      %c0_46 = arith.constant 0 : index
      %99 = vector.load %arg4[%c0_45, %c0_46] : memref<8x256xf32, #tpu.memory_space<vmem>>, vector<8x256xf32>
      %c0_47 = arith.constant 0 : index
      %c0_48 = arith.constant 0 : index
      %100 = vector.load %arg14[%c0_47, %c0_48] : memref<8x256xf32, #tpu.memory_space<vmem>>, vector<8x256xf32>
      tpu.vector_store %arg14[%c0_47, %c0_48], %99 {strides = array<i32>} : memref<8x256xf32, #tpu.memory_space<vmem>>, vector<8x256xf32>,
    } else {
    }
    %c0 = arith.constant 0 : index
    %c0_1 = arith.constant 0 : index
    %c0_2 = arith.constant 0 : index
    %3 = vector.load %arg2[%c0, %c0_1, %c0_2] : memref<1x8x128xf32, #tpu.memory_space<vmem>>, vector<1x8x128xf32>
    %4 = vector.shape_cast %3 : vector<1x8x128xf32> to vector<8x128xf32>
    %c0_3 = arith.constant 0 : index
    %c0_4 = arith.constant 0 : index
    %5 = vector.load %arg13[%c0_3, %c0_4] : memref<8x256xf32, #tpu.memory_space<vmem>>, vector<8x256xf32>
    %c0_5 = arith.constant 0 : index
    %c0_6 = arith.constant 0 : index
    %6 = vector.load %arg14[%c0_5, %c0_6] : memref<8x256xf32, #tpu.memory_space<vmem>>, vector<8x256xf32>
    %7 = tpu.concatenate %4, %5 in 1 : vector<8x128xf32>, vector<8x256xf32> -> vector<8x384xf32>
    %8 = arith.truncf %7 : vector<8x384xf32> to vector<8x384xbf16>
    %c0_7 = arith.constant 0 : index
    %c0_8 = arith.constant 0 : index
    %9 = vector.load %arg5[%c0_7, %c0_8] : memref<384x1280xbf16, #tpu.memory_space<vmem>>, vector<384x1280xbf16>
    %cst = arith.constant dense<0.000000e+00> : vector<8x1280xf32>
    %10 = tpu.matmul %8, %9, %cst {dimension_numbers = #tpu.dot_dimension_numbers<[1], [0], [0], [1], [0, 0, 1, 1], [], []>} : vector<8x384xbf16>, vector<384x1280xbf16>, vector<8x1280xf32> -> vector<8x1280xf32>
    %c0_9 = arith.constant 0 : index
    %c0_10 = arith.constant 0 : index
    %11 = vector.load %arg6[%c0_9, %c0_10] : memref<1x1280xf32, #tpu.memory_space<vmem>>, vector<1x1280xf32>
    %12 = vector.broadcast %11 : vector<1x1280xf32> to vector<8x1280xf32>
    %13 = arith.addf %10, %12 : vector<8x1280xf32>
    %14 = vector.extract_strided_slice %13 {offsets = [0, 0], sizes = [8, 256], strides = [1, 1]} : vector<8x1280xf32> to vector<8x256xf32>
    %15 = arith.negf %14 : vector<8x256xf32>
    %16 = math.exp %15 : vector<8x256xf32>
    %cst_11 = arith.constant 1.000000e+00 : f32
    %17 = vector.broadcast %cst_11 : f32 to vector<8x256xf32>
    %18 = arith.addf %17, %16 : vector<8x256xf32>
    %19 = arith.divf %17, %18 : vector<8x256xf32>
    %20 = vector.extract_strided_slice %13 {offsets = [0, 256], sizes = [8, 256], strides = [1, 1]} : vector<8x1280xf32> to vector<8x256xf32>
    %21 = arith.negf %20 : vector<8x256xf32>
    %22 = math.exp %21 : vector<8x256xf32>
    %cst_12 = arith.constant 1.000000e+00 : f32
    %23 = vector.broadcast %cst_12 : f32 to vector<8x256xf32>
    %24 = arith.addf %23, %22 : vector<8x256xf32>
    %25 = arith.divf %23, %24 : vector<8x256xf32>
    %26 = vector.extract_strided_slice %13 {offsets = [0, 512], sizes = [8, 256], strides = [1, 1]} : vector<8x1280xf32> to vector<8x256xf32>
    %27 = math.tanh %26 : vector<8x256xf32>
    %28 = vector.extract_strided_slice %13 {offsets = [0, 768], sizes = [8, 256], strides = [1, 1]} : vector<8x1280xf32> to vector<8x256xf32>
    %29 = arith.negf %28 : vector<8x256xf32>
    %30 = math.exp %29 : vector<8x256xf32>
    %cst_13 = arith.constant 1.000000e+00 : f32
    %31 = vector.broadcast %cst_13 : f32 to vector<8x256xf32>
    %32 = arith.addf %31, %30 : vector<8x256xf32>
    %33 = arith.divf %31, %32 : vector<8x256xf32>
    %34 = vector.extract_strided_slice %13 {offsets = [0, 1024], sizes = [8, 256], strides = [1, 1]} : vector<8x1280xf32> to vector<8x256xf32>
    %35 = arith.mulf %25, %6 : vector<8x256xf32>
    %36 = arith.mulf %19, %27 : vector<8x256xf32>
    %37 = arith.addf %35, %36 : vector<8x256xf32>
    %c0_14 = arith.constant 0 : index
    %c0_15 = arith.constant 0 : index
    %38 = vector.load %arg7[%c0_14, %c0_15] : memref<1x256xf32, #tpu.memory_space<vmem>>, vector<1x256xf32>
    %c0_16 = arith.constant 0 : index
    %c0_17 = arith.constant 0 : index
    %39 = vector.load %arg8[%c0_16, %c0_17] : memref<1x256xf32, #tpu.memory_space<vmem>>, vector<1x256xf32>
    %cst_18 = arith.constant dense<0.000000e+00> : vector<8xf32>
    %40 = vector.multi_reduction <add>, %37, %cst_18 [1] : vector<8x256xf32> to vector<8xf32>
    %41 = vector.shape_cast %40 : vector<8xf32> to vector<8x1xf32>
    %cst_19 = arith.constant 3.906250e-03 : f32
    %42 = vector.broadcast %cst_19 : f32 to vector<8x1xf32>
    %43 = arith.mulf %41, %42 : vector<8x1xf32>
    %44 = arith.mulf %37, %37 : vector<8x256xf32>
    %cst_20 = arith.constant dense<0.000000e+00> : vector<8xf32>
    %45 = vector.multi_reduction <add>, %44, %cst_20 [1] : vector<8x256xf32> to vector<8xf32>
    %46 = vector.shape_cast %45 : vector<8xf32> to vector<8x1xf32>
    %cst_21 = arith.constant 3.906250e-03 : f32
    %47 = vector.broadcast %cst_21 : f32 to vector<8x1xf32>
    %48 = arith.mulf %46, %47 : vector<8x1xf32>
    %49 = arith.mulf %43, %43 : vector<8x1xf32>
    %50 = arith.subf %48, %49 : vector<8x1xf32>
    %51 = vector.broadcast %43 : vector<8x1xf32> to vector<8x256xf32>
    %52 = arith.subf %37, %51 : vector<8x256xf32>
    %cst_22 = arith.constant 9.99999974E-6 : f32
    %53 = vector.broadcast %cst_22 : f32 to vector<8x1xf32>
    %54 = arith.addf %50, %53 : vector<8x1xf32>
    %55 = math.rsqrt %54 : vector<8x1xf32>
    %56 = vector.broadcast %55 : vector<8x1xf32> to vector<8x256xf32>
    %57 = arith.mulf %52, %56 : vector<8x256xf32>
    %58 = vector.broadcast %38 : vector<1x256xf32> to vector<8x256xf32>
    %59 = arith.mulf %57, %58 : vector<8x256xf32>
    %60 = vector.broadcast %39 : vector<1x256xf32> to vector<8x256xf32>
    %61 = arith.addf %59, %60 : vector<8x256xf32>
    %62 = math.tanh %61 : vector<8x256xf32>
    %63 = arith.mulf %33, %62 : vector<8x256xf32>
    %c0_23 = arith.constant 0 : index
    %c0_24 = arith.constant 0 : index
    %64 = vector.load %arg9[%c0_23, %c0_24] : memref<1x256xf32, #tpu.memory_space<vmem>>, vector<1x256xf32>
    %c0_25 = arith.constant 0 : index
    %c0_26 = arith.constant 0 : index
    %65 = vector.load %arg10[%c0_25, %c0_26] : memref<1x256xf32, #tpu.memory_space<vmem>>, vector<1x256xf32>
    %cst_27 = arith.constant dense<0.000000e+00> : vector<8xf32>
    %66 = vector.multi_reduction <add>, %63, %cst_27 [1] : vector<8x256xf32> to vector<8xf32>
    %67 = vector.shape_cast %66 : vector<8xf32> to vector<8x1xf32>
    %cst_28 = arith.constant 3.906250e-03 : f32
    %68 = vector.broadcast %cst_28 : f32 to vector<8x1xf32>
    %69 = arith.mulf %67, %68 : vector<8x1xf32>
    %70 = arith.mulf %63, %63 : vector<8x256xf32>
    %cst_29 = arith.constant dense<0.000000e+00> : vector<8xf32>
    %71 = vector.multi_reduction <add>, %70, %cst_29 [1] : vector<8x256xf32> to vector<8xf32>
    %72 = vector.shape_cast %71 : vector<8xf32> to vector<8x1xf32>
    %cst_30 = arith.constant 3.906250e-03 : f32
    %73 = vector.broadcast %cst_30 : f32 to vector<8x1xf32>
    %74 = arith.mulf %72, %73 : vector<8x1xf32>
    %75 = arith.mulf %69, %69 : vector<8x1xf32>
    %76 = arith.subf %74, %75 : vector<8x1xf32>
    %77 = vector.broadcast %69 : vector<8x1xf32> to vector<8x256xf32>
    %78 = arith.subf %63, %77 : vector<8x256xf32>
    %cst_31 = arith.constant 9.99999974E-6 : f32
    %79 = vector.broadcast %cst_31 : f32 to vector<8x1xf32>
    %80 = arith.addf %76, %79 : vector<8x1xf32>
    %81 = math.rsqrt %80 : vector<8x1xf32>
    %82 = vector.broadcast %81 : vector<8x1xf32> to vector<8x256xf32>
    %83 = arith.mulf %78, %82 : vector<8x256xf32>
    %84 = vector.broadcast %64 : vector<1x256xf32> to vector<8x256xf32>
    %85 = arith.mulf %83, %84 : vector<8x256xf32>
    %86 = vector.broadcast %65 : vector<1x256xf32> to vector<8x256xf32>
    %87 = arith.addf %85, %86 : vector<8x256xf32>
    %88 = arith.addf %87, %34 : vector<8x256xf32>
    %c0_32 = arith.constant 0 : index
    %c0_33 = arith.constant 0 : index
    %89 = vector.load %arg13[%c0_32, %c0_33] : memref<8x256xf32, #tpu.memory_space<vmem>>, vector<8x256xf32>
    tpu.vector_store %arg13[%c0_32, %c0_33], %88 {strides = array<i32>} : memref<8x256xf32, #tpu.memory_space<vmem>>, vector<8x256xf32>,
    %c0_34 = arith.constant 0 : index
    %c0_35 = arith.constant 0 : index
    %90 = vector.load %arg14[%c0_34, %c0_35] : memref<8x256xf32, #tpu.memory_space<vmem>>, vector<8x256xf32>
    tpu.vector_store %arg14[%c0_34, %c0_35], %61 {strides = array<i32>} : memref<8x256xf32, #tpu.memory_space<vmem>>, vector<8x256xf32>,
    %c0_36 = arith.constant 0 : index
    %c0_37 = arith.constant 0 : index
    %c0_38 = arith.constant 0 : index
    %91 = vector.load %arg11[%c0_36, %c0_37, %c0_38] : memref<1x8x256xf32, #tpu.memory_space<vmem>>, vector<1x8x256xf32>
    %92 = vector.shape_cast %91 : vector<1x8x256xf32> to vector<8x256xf32>
    %93 = vector.shape_cast %88 : vector<8x256xf32> to vector<1x8x256xf32>
    tpu.vector_store %arg11[%c0_36, %c0_37, %c0_38], %93 {strides = array<i32>} : memref<1x8x256xf32, #tpu.memory_space<vmem>>, vector<1x8x256xf32>,
    %c0_i32_39 = arith.constant 0 : i32
    %94 = arith.cmpi eq, %arg1, %c0_i32_39 : i32
    %95 = arith.extui %94 : i1 to i32
    %c0_i32_40 = arith.constant 0 : i32
    %96 = arith.cmpi ne, %95, %c0_i32_40 : i32
    scf.if %96 {
      %c0_41 = arith.constant 0 : index
      %c0_42 = arith.constant 0 : index
      %97 = vector.load %arg12[%c0_41, %c0_42] : memref<8x256xf32, #tpu.memory_space<vmem>>, vector<8x256xf32>
      tpu.vector_store %arg12[%c0_41, %c0_42], %61 {strides = array<i32>} : memref<8x256xf32, #tpu.memory_space<vmem>>, vector<8x256xf32>,
    } else {
    }
    return
  }
  func.func @transform_0(%arg0: i32, %arg1: i32) -> (i32, i32, i32) {
    %c0_i32 = arith.constant 0 : i32
    %c0_i32_0 = arith.constant 0 : i32
    return %arg1, %arg0, %c0_i32 : i32, i32, i32
  }
  func.func @transform_1(%arg0: i32, %arg1: i32) -> (i32, i32) {
    %c0_i32 = arith.constant 0 : i32
    %c0_i32_0 = arith.constant 0 : i32
    return %arg0, %c0_i32 : i32, i32
  }
  func.func @transform_2(%arg0: i32, %arg1: i32) -> (i32, i32) {
    %c0_i32 = arith.constant 0 : i32
    %c0_i32_0 = arith.constant 0 : i32
    return %arg0, %c0_i32 : i32, i32
  }
  func.func @transform_3(%arg0: i32, %arg1: i32) -> (i32, i32) {
    %c0_i32 = arith.constant 0 : i32
    %c0_i32_0 = arith.constant 0 : i32
    %c0_i32_1 = arith.constant 0 : i32
    return %c0_i32, %c0_i32_0 : i32, i32
  }
  func.func @transform_4(%arg0: i32, %arg1: i32) -> (i32, i32) {
    %c0_i32 = arith.constant 0 : i32
    %c0_i32_0 = arith.constant 0 : i32
    %c0_i32_1 = arith.constant 0 : i32
    return %c0_i32, %c0_i32_0 : i32, i32
  }
  func.func @transform_5(%arg0: i32, %arg1: i32) -> (i32, i32) {
    %c0_i32 = arith.constant 0 : i32
    %c0_i32_0 = arith.constant 0 : i32
    %c0_i32_1 = arith.constant 0 : i32
    return %c0_i32, %c0_i32_0 : i32, i32
  }
  func.func @transform_6(%arg0: i32, %arg1: i32) -> (i32, i32) {
    %c0_i32 = arith.constant 0 : i32
    %c0_i32_0 = arith.constant 0 : i32
    %c0_i32_1 = arith.constant 0 : i32
    return %c0_i32, %c0_i32_0 : i32, i32
  }
  func.func @transform_7(%arg0: i32, %arg1: i32) -> (i32, i32) {
    %c0_i32 = arith.constant 0 : i32
    %c0_i32_0 = arith.constant 0 : i32
    %c0_i32_1 = arith.constant 0 : i32
    return %c0_i32, %c0_i32_0 : i32, i32
  }
  func.func @transform_8(%arg0: i32, %arg1: i32) -> (i32, i32) {
    %c0_i32 = arith.constant 0 : i32
    %c0_i32_0 = arith.constant 0 : i32
    %c0_i32_1 = arith.constant 0 : i32
    return %c0_i32, %c0_i32_0 : i32, i32
  }
  func.func @transform_9(%arg0: i32, %arg1: i32) -> (i32, i32, i32) {
    %c0_i32 = arith.constant 0 : i32
    %c0_i32_0 = arith.constant 0 : i32
    return %arg1, %arg0, %c0_i32 : i32, i32, i32
  }
  func.func @transform_10(%arg0: i32, %arg1: i32) -> (i32, i32) {
    %c0_i32 = arith.constant 0 : i32
    %c0_i32_0 = arith.constant 0 : i32
    return %arg0, %c0_i32 : i32, i32
  }
}

</mosaic_0001>

<bundles_post_ra>
// kernel: tpu_custom_call.1
= control target key start
LH: loop header
LB: loop body
LE: loop exit
PB: predicated region body
PF: predicated region fallthrough
CT: control target
= control target key end

     0   :  { %16 = vsyncpa [#allocation5], 0  ;;  %s3185_s0 = inlined_call_operand.hbm [shape: f32[1,8,128], index: 0, kind: input, shape index: {}]   ;;  %s3186_s1 = inlined_call_operand.hbm [shape: f32[8,256], index: 1, kind: input, shape index: {}]   ;;  %s3187_s2 = inlined_call_operand.hbm [shape: f32[8,256], index: 2, kind: input, shape index: {}]   ;;  %s3188_s3 = inlined_call_operand.hbm [shape: bf16[384,1280], index: 3, kind: input, shape index: {}]   ;;  %s3189_s4 = inlined_call_operand.hbm [shape: f32[1,1280], index: 4, kind: input, shape index: {}]   ;;  %s3190_s5 = inlined_call_operand.vmem [shape: f32[1,256], index: 5, kind: input, shape index: {}]   ;;  %s3191_s6 = inlined_call_operand.vmem [shape: f32[1,256], index: 6, kind: input, shape index: {}]   ;;  %s3192_s7 = inlined_call_operand.vmem [shape: f32[1,256], index: 7, kind: input, shape index: {}]   ;;  %s3193_s8 = inlined_call_operand.vmem [shape: f32[1,256], index: 8, kind: input, shape index: {}]   ;;  %s3194_s9 = inlined_call_operand.hbm [shape: f32[1,8,256], index: 9, kind: output, shape index: {0}]   ;;  %s3195_s10 = inlined_call_operand.hbm [shape: f32[8,256], index: 10, kind: output, shape index: {1}]  }
   0x1   :  { %17 = vsyncpa [#allocation8], 0 }
   0x2   :  { %18 = vsyncpa [#allocation11], 0 }
   0x3   :  { %19 = vsyncpa [#allocation6], 0 }
   0x4   :  { %20 = vsyncpa [#allocation15], 0  ;;  %s3007_s13 = smov [#allocation7]   ;;  %s3008_s15 = smov [#allocation10]  }
   0x5   :  { %s37_s14 = sshll.u32 %s3007_s13, 4  ;;  %s56_s16 = sshll.u32 %s3008_s15, 4  ;;  %s38_s14 = int_to_ptr.vmem [resolvable:$true] %s37_s14  ;;  %s57_s16 = int_to_ptr.vmem [resolvable:$true] %s56_s16 }
   0x6   :  { %s2865_s17 = scalar_lea.vmem %s38_s14, 256  ;;  %p2870_p1 = scmp.lt.s32.totalorder %s38_s14, %s38_s14 }
   0x7   :  { %p2866_p0 = scmp.ne.s32.totalorder %s38_s14, %s2865_s17  ;;  %p2871_p2 = scmp.lt.s32.totalorder %s2865_s17, %s2865_s17 }
   0x9   :  { %p2872_p3 = por %p2871_p2, %p2870_p1 }
   0xb   :  { %p2873_p4 = pnand %p2872_p3, %p2866_p0 }
   0xd   :  { %2876 = shalt.err (!%p2873_p4)
}
   0xe   :  { %40 = dma.hbm_to_vmem [thread:$0]  %s3186_s1, 256, %s38_s14, [#allocation8]  }
   0xf   :  { %s2885_s20 = scalar_lea.vmem %s57_s16, 30720  ;;  %p2890_p6 = scmp.lt.s32.totalorder %s57_s16, %s57_s16 }
  0x10   :  { %p2886_p5 = scmp.ne.s32.totalorder %s57_s16, %s2885_s20  ;;  %p2891_p7 = scmp.lt.s32.totalorder %s2885_s20, %s2885_s20 }
  0x12   :  { %p2892_p8 = por %p2891_p7, %p2890_p6 }
  0x14   :  { %p2893_p9 = pnand %p2892_p8, %p2886_p5 }
  0x16   :  { %2896 = shalt.err (!%p2893_p9)
}
  0x17   :  { %s3009_s21 = smov 640   ;;  %s3010_s22 = smov 40  }
  0x18   :  { %62 = dma.hbm_to_vmem [thread:$0]  %s3188_s3, 30720, %s57_s16, [#allocation11], %s3009_s21, %s3009_s21, %s3010_s22  }
  0x19   :  { %s3011_s25 = smov [#allocation4]   ;;  %s3012_s27 = smov [#allocation9]  }
  0x1a   :  { %s27_s26 = sshll.u32 %s3011_s25, 4  ;;  %s47_s28 = sshll.u32 %s3012_s27, 4  ;;  %s28_s26 = int_to_ptr.vmem [resolvable:$true] %s27_s26  ;;  %s48_s28 = int_to_ptr.vmem [resolvable:$true] %s47_s28 }
  0x1b   :  { %s2905_s1 = scalar_lea.vmem %s28_s26, 128  ;;  %p2910_p11 = scmp.lt.s32.totalorder %s28_s26, %s28_s26 }
  0x1c   :  { %p2906_p10 = scmp.ne.s32.totalorder %s28_s26, %s2905_s1  ;;  %p2911_p12 = scmp.lt.s32.totalorder %s2905_s1, %s2905_s1 }
  0x1e   :  { %p2912_p13 = por %p2911_p12, %p2910_p11 }
  0x20   :  { %p2913_p0 = pnand %p2912_p13, %p2906_p10 }
  0x22   :  { %2916 = shalt.err (!%p2913_p0)
}
  0x23   :  { %30 = dma.hbm_to_vmem [thread:$0]  %s3185_s0, 128, %s28_s26, [#allocation5]  }
  0x24   :  { %s2925_s11 = scalar_lea.vmem %s48_s28, 256  ;;  %p2930_p2 = scmp.lt.s32.totalorder %s48_s28, %s48_s28 }
  0x25   :  { %p2926_p1 = scmp.ne.s32.totalorder %s48_s28, %s2925_s11  ;;  %p2931_p3 = scmp.lt.s32.totalorder %s2925_s11, %s2925_s11 }
  0x27   :  { %p2932_p4 = por %p2931_p3, %p2930_p2 }
  0x29   :  { %p2933_p5 = pnand %p2932_p4, %p2926_p1 }
  0x2b   :  { %2936 = shalt.err (!%p2933_p5)
}
  0x2c   :  { %50 = dma.hbm_to_vmem [thread:$0]  %s3187_s2, 256, %s48_s28, [#allocation8]  }
  0x2d   :  { %s3013_s13 = smov [#allocation12]  }
  0x2e   :  { %s69_s14 = sshll.u32 %s3013_s13, 4  ;;  %s70_s14 = int_to_ptr.vmem [resolvable:$true] %s69_s14 }
  0x2f   :  { %s2945_s15 = scalar_lea.vmem %s70_s14, 160  ;;  %p2950_p7 = scmp.lt.s32.totalorder %s70_s14, %s70_s14 }
  0x30   :  { %p2946_p6 = scmp.ne.s32.totalorder %s70_s14, %s2945_s15  ;;  %p2951_p8 = scmp.lt.s32.totalorder %s2945_s15, %s2945_s15 }
  0x32   :  { %p2952_p9 = por %p2951_p8, %p2950_p7 }
  0x34   :  { %p2953_p10 = pnand %p2952_p9, %p2946_p6 }
  0x36   :  { %2956 = shalt.err (!%p2953_p10)
}
  0x37   :  { %72 = dma.hbm_to_vmem [thread:$0]  %s3189_s4, 160, %s70_s14, [#allocation11]  }
  0x38   :  { %2997 = dma.done.wait [#allocation5], 128  }
  0x39   :  { %2998 = vsyncadd [#allocation5], 4294967168 }
  0x3a   :  { %2999 = dma.done.wait [#allocation8], 512  }
  0x3b   :  { %3000 = vsyncadd [#allocation8], 4294966784 }
  0x3c   :  { %3001 = dma.done.wait [#allocation11], 30880  }
  0x3d   :  { %3002 = vsyncadd [#allocation11], 4294936416  ;;  %v3014_v0 = vmov 0   ;;  %v2461_v1 = vld [vmem:[#allocation10 + $0x234] ss:$40 sps:$4 sm:$0xff]   ;;  %v102_v33 = vld [vmem:[#allocation7 + $0x8] sm:$0xff] }
  0x3e   :  { %1684 = vmatprep.mubr.bf16.mxu1 %v3014_v0  ;;  %v2463_v2 = vld [vmem:[#allocation10 + $0x734] ss:$40 sps:$4 sm:$0xff]   ;;  %1611 = vmatprep.subr.bf16.mxu0 %v2461_v1  ;;  %v2465_v3 = vld [vmem:[#allocation10 + $0x230] ss:$40 sps:$4 sm:$0xff]   ;;  %v2467_v5 = vld [vmem:[#allocation10 + $0x1e4] ss:$40 sps:$4 sm:$0xff]   ;;  %v3088_v38 = vpack.c.bf16 %v102_v33, %v102_v33 }
  0x3f   :  { %v2466_v4 = vld [vmem:[#allocation10 + $0x730] ss:$40 sps:$4 sm:$0xff]   ;;  %1652 = vmatprep.subr.bf16.mxu1 %v2463_v2  ;;  %1612 = vmatpush1.bf16.msra.mxu0 %v2465_v3  ;;  %v2469_v6 = vld [vmem:[#allocation10 + $0x6e4] ss:$40 sps:$4 sm:$0xff]   ;;  %v2471_v7 = vld [vmem:[#allocation10 + $0x1e0] ss:$40 sps:$4 sm:$0xff]  }
  0x40   :  { %1653 = vmatpush1.bf16.msra.mxu1 %v2466_v4  ;;  %1613 = vmatprep.subr.bf16.mxu0 %v2467_v5  ;;  %v2472_v8 = vld [vmem:[#allocation10 + $0x6e0] ss:$40 sps:$4 sm:$0xff]   ;;  %v2473_v9 = vld [vmem:[#allocation10 + $0x194] ss:$40 sps:$4 sm:$0xff]   ;;  %v2477_v11 = vld [vmem:[#allocation10 + $0x190] ss:$40 sps:$4 sm:$0xff]  }
  0x41   :  { %1654 = vmatprep.subr.bf16.mxu1 %v2469_v6  ;;  %v2475_v10 = vld [vmem:[#allocation10 + $0x694] ss:$40 sps:$4 sm:$0xff]   ;;  %v2478_v12 = vld [vmem:[#allocation10 + $0x690] ss:$40 sps:$4 sm:$0xff]   ;;  %v2479_v13 = vld [vmem:[#allocation10 + $0x144] ss:$40 sps:$4 sm:$0xff]  }
  0x42   :  { %v2481_v14 = vld [vmem:[#allocation10 + $0x644] ss:$40 sps:$4 sm:$0xff]   ;;  %v2483_v15 = vld [vmem:[#allocation10 + $0x140] ss:$40 sps:$4 sm:$0xff]   ;;  %v2485_v17 = vld [vmem:[#allocation10 + $0xf4] ss:$40 sps:$4 sm:$0xff]  }
  0x43   :  { %1614 = vmatpush1.bf16.msra.mxu0 %v2471_v7  ;;  %v2484_v16 = vld [vmem:[#allocation10 + $0x640] ss:$40 sps:$4 sm:$0xff]   ;;  %v2487_v18 = vld [vmem:[#allocation10 + $0x5f4] ss:$40 sps:$4 sm:$0xff]   ;;  %v2489_v19 = vld [vmem:[#allocation10 + $0xf0] ss:$40 sps:$4 sm:$0xff]  }
  0x44   :  { %1655 = vmatpush1.bf16.msra.mxu1 %v2472_v8  ;;  %1615 = vmatprep.subr.bf16.mxu0 %v2473_v9  ;;  %v2490_v20 = vld [vmem:[#allocation10 + $0x5f0] ss:$40 sps:$4 sm:$0xff]   ;;  %v2491_v21 = vld [vmem:[#allocation10 + $0xa4] ss:$40 sps:$4 sm:$0xff]   ;;  %v2495_v23 = vld [vmem:[#allocation10 + $0xa0] ss:$40 sps:$4 sm:$0xff]  }
  0x45   :  { %1656 = vmatprep.subr.bf16.mxu1 %v2475_v10  ;;  %v2493_v22 = vld [vmem:[#allocation10 + $0x5a4] ss:$40 sps:$4 sm:$0xff]   ;;  %v2496_v24 = vld [vmem:[#allocation10 + $0x5a0] ss:$40 sps:$4 sm:$0xff]   ;;  %v2497_v25 = vld [vmem:[#allocation10 + $0x54] ss:$40 sps:$4 sm:$0xff]  }
  0x46   :  { %v2499_v26 = vld [vmem:[#allocation10 + $0x554] ss:$40 sps:$4 sm:$0xff]   ;;  %v2501_v27 = vld [vmem:[#allocation10 + $0x50] ss:$40 sps:$4 sm:$0xff]   ;;  %v2503_v29 = vld [vmem:[#allocation10 + $0x4] ss:$40 sps:$4 sm:$0xff]  }
  0x47   :  { %1616 = vmatpush1.bf16.msra.mxu0 %v2477_v11  ;;  %v2502_v28 = vld [vmem:[#allocation10 + $0x550] ss:$40 sps:$4 sm:$0xff]   ;;  %v2505_v30 = vld [vmem:[#allocation10 + $0x504] ss:$40 sps:$4 sm:$0xff]   ;;  %v2507_v31 = vld [vmem:[#allocation10] ss:$40 sps:$4 sm:$0xff]  }
  0x48   :  { %1657 = vmatpush1.bf16.msra.mxu1 %v2478_v12  ;;  %1617 = vmatprep.subr.bf16.mxu0 %v2479_v13  ;;  %v2508_v32 = vld [vmem:[#allocation10 + $0x500] ss:$40 sps:$4 sm:$0xff]   ;;  %v2509_v34 = vld [vmem:[#allocation10 + $0x4b4] ss:$40 sps:$4 sm:$0xff]   ;;  %v2514_v37 = vld [vmem:[#allocation10 + $0x4b0] ss:$40 sps:$4 sm:$0xff]  }
  0x49   :  { %1658 = vmatprep.subr.bf16.mxu1 %v2481_v14  ;;  %v2513_v35 = vld [vmem:[#allocation10 + $0x23c] ss:$40 sps:$4 sm:$0xff]   ;;  %v2511_v36 = vld [vmem:[#allocation10 + $0x238] ss:$40 sps:$4 sm:$0xff]   ;;  %v2519_v40 = vld [vmem:[#allocation10 + $0x1ec] ss:$40 sps:$4 sm:$0xff]  }
  0x4a   :  { %v2515_v39 = vld [vmem:[#allocation10 + $0x464] ss:$40 sps:$4 sm:$0xff]   ;;  %v2517_v41 = vld [vmem:[#allocation10 + $0x1e8] ss:$40 sps:$4 sm:$0xff]   ;;  %v2521_v43 = vld [vmem:[#allocation10 + $0x414] ss:$40 sps:$4 sm:$0xff]  }
  0x4b   :  { %1618 = vmatpush1.bf16.msra.mxu0 %v2483_v15  ;;  %v2520_v42 = vld [vmem:[#allocation10 + $0x460] ss:$40 sps:$4 sm:$0xff]   ;;  %v2525_v44 = vld [vmem:[#allocation10 + $0x19c] ss:$40 sps:$4 sm:$0xff]   ;;  %v2526_v46 = vld [vmem:[#allocation10 + $0x410] ss:$40 sps:$4 sm:$0xff]  }
  0x4c   :  { %1659 = vmatpush1.bf16.msra.mxu1 %v2484_v16  ;;  %1619 = vmatprep.subr.bf16.mxu0 %v2485_v17  ;;  %v2523_v45 = vld [vmem:[#allocation10 + $0x198] ss:$40 sps:$4 sm:$0xff]   ;;  %v2527_v47 = vld [vmem:[#allocation10 + $0x3c4] ss:$40 sps:$4 sm:$0xff]   ;;  %v2529_v49 = vld [vmem:[#allocation10 + $0x148] ss:$40 sps:$4 sm:$0xff]  }
  0x4d   :  { %1660 = vmatprep.subr.bf16.mxu1 %v2487_v18  ;;  %v2531_v48 = vld [vmem:[#allocation10 + $0x14c] ss:$40 sps:$4 sm:$0xff]   ;;  %v101_v50 = vld [vmem:[#allocation7] sm:$0xff]  ;;  %v2538_v56 = vld [vmem:[#allocation10 + $0x370] ss:$40 sps:$4 sm:$0xff]  }
  0x4e   :  { %v2532_v51 = vld [vmem:[#allocation10 + $0x3c0] ss:$40 sps:$4 sm:$0xff]   ;;  %v2533_v52 = vld [vmem:[#allocation10 + $0x374] ss:$40 sps:$4 sm:$0xff]   ;;  %v3091_v53 = vpack.c.bf16 %v101_v50, %v101_v50  ;;  %v2539_v57 = vld [vmem:[#allocation10 + $0x324] ss:$40 sps:$4 sm:$0xff]  }
  0x4f   :  { %1620 = vmatpush1.bf16.msra.mxu0 %v2489_v19  ;;  %v2537_v54 = vld [vmem:[#allocation10 + $0xfc] ss:$40 sps:$4 sm:$0xff]   ;;  %v2535_v55 = vld [vmem:[#allocation10 + $0xf8] ss:$40 sps:$4 sm:$0xff]   ;;  %v2543_v58 = vld [vmem:[#allocation10 + $0xac] ss:$40 sps:$4 sm:$0xff]  }
  0x50   :  { %1661 = vmatpush1.bf16.msra.mxu1 %v2490_v20  ;;  %1621 = vmatprep.subr.bf16.mxu0 %v2491_v21  ;;  %v2541_v59 = vld [vmem:[#allocation10 + $0xa8] ss:$40 sps:$4 sm:$0xff]   ;;  %v2545_v61 = vld [vmem:[#allocation10 + $0x2d4] ss:$40 sps:$4 sm:$0xff]   ;;  %v2547_v63 = vld [vmem:[#allocation10 + $0x58] ss:$40 sps:$4 sm:$0xff]  }
  0x51   :  { %1662 = vmatprep.subr.bf16.mxu1 %v2493_v22  ;;  %1643 = vmatprep.mubr.bf16.mxu0 %v3091_v53  ;;  %v2544_v60 = vld [vmem:[#allocation10 + $0x320] ss:$40 sps:$4 sm:$0xff]   ;;  %v2549_v62 = vld [vmem:[#allocation10 + $0x5c] ss:$40 sps:$4 sm:$0xff]   ;;  %v2550_v1 = vld [vmem:[#allocation10 + $0x2d0] ss:$40 sps:$4 sm:$0xff]  }
  0x52   :  { %v2551_v2 = vld [vmem:[#allocation10 + $0x284] ss:$40 sps:$4 sm:$0xff]   ;;  %v2553_v4 = vld [vmem:[#allocation10 + $0x8] ss:$40 sps:$4 sm:$0xff]   ;;  %v109_v6 = vld [vmem:[#allocation4] sm:$0xff] }
  0x53   :  { %1622 = vmatpush1.bf16.msra.mxu0 %v2495_v23  ;;  %v2555_v3 = vld [vmem:[#allocation10 + $0xc] ss:$40 sps:$4 sm:$0xff]   ;;  %v2556_v5 = vld [vmem:[#allocation10 + $0x280] ss:$40 sps:$4 sm:$0xff]   ;;  %v2559_v7 = vld [vmem:[#allocation10 + $0x4bc] ss:$40 sps:$4 sm:$0xff]   ;;  %v3095_v9 = vpack.c.bf16 %v109_v6, %v109_v6 }
  0x54   :  { %1663 = vmatpush1.bf16.msra.mxu1 %v2496_v24  ;;  %1623 = vmatprep.subr.bf16.mxu0 %v2497_v25  ;;  %v2562_v8 = vld [vmem:[#allocation10 + $0x73c] ss:$40 sps:$4 sm:$0xff]   ;;  %v2557_v10 = vld [vmem:[#allocation10 + $0x4b8] ss:$40 sps:$4 sm:$0xff]   ;;  %v2565_v12 = vld [vmem:[#allocation10 + $0x46c] ss:$40 sps:$4 sm:$0xff]  }
  0x55   :  { %1664 = vmatprep.subr.bf16.mxu1 %v2499_v26  ;;  %v2560_v11 = vld [vmem:[#allocation10 + $0x738] ss:$40 sps:$4 sm:$0xff]   ;;  %v2568_v13 = vld [vmem:[#allocation10 + $0x6ec] ss:$40 sps:$4 sm:$0xff]   ;;  %v2563_v14 = vld [vmem:[#allocation10 + $0x468] ss:$40 sps:$4 sm:$0xff]  }
  0x56   :  { %v2566_v15 = vld [vmem:[#allocation10 + $0x6e8] ss:$40 sps:$4 sm:$0xff]   ;;  %v2571_v16 = vld [vmem:[#allocation10 + $0x41c] ss:$40 sps:$4 sm:$0xff]   ;;  %v2569_v18 = vld [vmem:[#allocation10 + $0x418] ss:$40 sps:$4 sm:$0xff]  }
  0x57   :  { %1624 = vmatpush1.bf16.msra.mxu0 %v2501_v27  ;;  %v2574_v17 = vld [vmem:[#allocation10 + $0x69c] ss:$40 sps:$4 sm:$0xff]   ;;  %v2572_v19 = vld [vmem:[#allocation10 + $0x698] ss:$40 sps:$4 sm:$0xff]   ;;  %v2577_v20 = vld [vmem:[#allocation10 + $0x3cc] ss:$40 sps:$4 sm:$0xff]  }
  0x58   :  { %1665 = vmatpush1.bf16.msra.mxu1 %v2502_v28  ;;  %1625 = vmatprep.subr.bf16.mxu0 %v2503_v29  ;;  %v2580_v21 = vld [vmem:[#allocation10 + $0x64c] ss:$40 sps:$4 sm:$0xff]   ;;  %v2575_v22 = vld [vmem:[#allocation10 + $0x3c8] ss:$40 sps:$4 sm:$0xff]   ;;  %v2583_v24 = vld [vmem:[#allocation10 + $0x37c] ss:$40 sps:$4 sm:$0xff]  }
  0x59   :  { %1666 = vmatprep.subr.bf16.mxu1 %v2505_v30  ;;  %v2578_v23 = vld [vmem:[#allocation10 + $0x648] ss:$40 sps:$4 sm:$0xff]   ;;  %v2586_v25 = vld [vmem:[#allocation10 + $0x5fc] ss:$40 sps:$4 sm:$0xff]   ;;  %v2581_v26 = vld [vmem:[#allocation10 + $0x378] ss:$40 sps:$4 sm:$0xff]  }
  0x5a   :  { %v2584_v27 = vld [vmem:[#allocation10 + $0x5f8] ss:$40 sps:$4 sm:$0xff]   ;;  %v2589_v28 = vld [vmem:[#allocation10 + $0x32c] ss:$40 sps:$4 sm:$0xff]   ;;  %v2587_v30 = vld [vmem:[#allocation10 + $0x328] ss:$40 sps:$4 sm:$0xff]  }
  0x5b   :  { %1626 = vmatpush1.bf16.msra.mxu0 %v2507_v31  ;;  %v2592_v29 = vld [vmem:[#allocation10 + $0x5ac] ss:$40 sps:$4 sm:$0xff]   ;;  %v2590_v31 = vld [vmem:[#allocation10 + $0x5a8] ss:$40 sps:$4 sm:$0xff]   ;;  %v2598_v33 = vld [vmem:[#allocation10 + $0x55c] ss:$40 sps:$4 sm:$0xff]  }
  0x5c   :  { %1667 = vmatpush1.bf16.msra.mxu1 %v2508_v32  ;;  %1627 = vmatprep.subr.bf16.mxu0 %v2509_v34  ;;  %v2595_v32 = vld [vmem:[#allocation10 + $0x2dc] ss:$40 sps:$4 sm:$0xff]   ;;  %v2593_v34 = vld [vmem:[#allocation10 + $0x2d8] ss:$40 sps:$4 sm:$0xff]  }
  0x5d   :  { %1693 = vmatprep.subr.bf16.mxu1 %v2513_v35  ;;  %v2596_v35 = vld [vmem:[#allocation10 + $0x558] ss:$40 sps:$4 sm:$0xff]   ;;  %v2643_v50 = vld [vmem:[#allocation10 + $0x6a4] ss:$40 sps:$4 sm:$0xff]  }
  0x5e   :  { %v2665_v6 = vld [vmem:[#allocation10 + $0x560] ss:$40 sps:$4 sm:$0xff]  }
  0x5f   :  { %1685 = vmatmul.mubr.bf16.vlgmr.msra.gmra.mxu1 %v3088_v38  ;;  %1628 = vmatpush2.bf16.msra.mxu0 %v2514_v37  ;;  %v2604_v37 = vld [vmem:[#allocation10 + $0x50c] ss:$40 sps:$4 sm:$0xff]  }
  0x60   :  { %1694 = vmatpush1.bf16.msra.mxu1 %v2511_v36  ;;  %1629 = vmatprep.subr.bf16.mxu0 %v2515_v39  ;;  %v2601_v36 = vld [vmem:[#allocation10 + $0x28c] ss:$40 sps:$4 sm:$0xff]   ;;  %v2599_v39 = vld [vmem:[#allocation10 + $0x288] ss:$40 sps:$4 sm:$0xff]  }
  0x61   :  { %1695 = vmatprep.subr.bf16.mxu1 %v2519_v40  ;;  %1725 = vmatprep.mubr.bf16.mxu1 %v3091_v53  ;;  %v2602_v40 = vld [vmem:[#allocation10 + $0x508] ss:$40 sps:$4 sm:$0xff]  }
  0x63   :  { %1630 = vmatpush2.bf16.msra.mxu0 %v2520_v42  ;;  %v2631_v42 = vld [vmem:[#allocation10 + $0x744] ss:$40 sps:$4 sm:$0xff]  }
  0x64   :  { %1696 = vmatpush1.bf16.msra.mxu1 %v2517_v41  ;;  %1631 = vmatprep.subr.bf16.mxu0 %v2521_v43  ;;  %v2607_v41 = vld [vmem:[#allocation10 + $0x244] ss:$40 sps:$4 sm:$0xff]   ;;  %v2605_v43 = vld [vmem:[#allocation10 + $0x240] ss:$40 sps:$4 sm:$0xff]  }
  0x65   :  { %1697 = vmatprep.subr.bf16.mxu1 %v2525_v44  ;;  %v2610_v44 = vld [vmem:[#allocation10 + $0x1f4] ss:$40 sps:$4 sm:$0xff]  }
  0x67   :  { %1632 = vmatpush2.bf16.msra.mxu0 %v2526_v46  ;;  %v2637_v46 = vld [vmem:[#allocation10 + $0x6f4] ss:$40 sps:$4 sm:$0xff]  }
  0x68   :  { %1698 = vmatpush1.bf16.msra.mxu1 %v2523_v45  ;;  %1633 = vmatprep.subr.bf16.mxu0 %v2527_v47  ;;  %v2629_v45 = vld [vmem:[#allocation10 + $0x740] ss:$40 sps:$4 sm:$0xff]   ;;  %v2608_v47 = vld [vmem:[#allocation10 + $0x1f0] ss:$40 sps:$4 sm:$0xff]  }
  0x69   :  { %1699 = vmatprep.subr.bf16.mxu1 %v2531_v48  ;;  %v2635_v48 = vld [vmem:[#allocation10 + $0x6f0] ss:$40 sps:$4 sm:$0xff]  }
  0x6b   :  { %1634 = vmatpush2.bf16.msra.mxu0 %v2532_v51  ;;  %v2611_v51 = vld [vmem:[#allocation10 + $0x1a0] ss:$40 sps:$4 sm:$0xff]  }
  0x6c   :  { %1700 = vmatpush1.bf16.msra.mxu1 %v2529_v49  ;;  %1635 = vmatprep.subr.bf16.mxu0 %v2533_v52  ;;  %v2613_v49 = vld [vmem:[#allocation10 + $0x1a4] ss:$40 sps:$4 sm:$0xff]   ;;  %v2641_v52 = vld [vmem:[#allocation10 + $0x6a0] ss:$40 sps:$4 sm:$0xff]  }
  0x6d   :  { %1701 = vmatprep.subr.bf16.mxu1 %v2537_v54  ;;  %v2616_v54 = vld [vmem:[#allocation10 + $0x154] ss:$40 sps:$4 sm:$0xff]  }
  0x6f   :  { %1636 = vmatpush2.bf16.msra.mxu0 %v2538_v56  ;;  %v2614_v56 = vld [vmem:[#allocation10 + $0x150] ss:$40 sps:$4 sm:$0xff]  }
  0x70   :  { %1702 = vmatpush1.bf16.msra.mxu1 %v2535_v55  ;;  %1637 = vmatprep.subr.bf16.mxu0 %v2539_v57  ;;  %v2649_v55 = vld [vmem:[#allocation10 + $0x654] ss:$40 sps:$4 sm:$0xff]   ;;  %v2647_v57 = vld [vmem:[#allocation10 + $0x650] ss:$40 sps:$4 sm:$0xff]  }
  0x71   :  { %1703 = vmatprep.subr.bf16.mxu1 %v2543_v58  ;;  %v2619_v58 = vld [vmem:[#allocation10 + $0x104] ss:$40 sps:$4 sm:$0xff]  }
  0x73   :  { %1638 = vmatpush2.bf16.msra.mxu0 %v2544_v60  ;;  %v2617_v60 = vld [vmem:[#allocation10 + $0x100] ss:$40 sps:$4 sm:$0xff]  }
  0x74   :  { %1704 = vmatpush1.bf16.msra.mxu1 %v2541_v59  ;;  %1639 = vmatprep.subr.bf16.mxu0 %v2545_v61  ;;  %v2655_v59 = vld [vmem:[#allocation10 + $0x604] ss:$40 sps:$4 sm:$0xff]   ;;  %v2653_v61 = vld [vmem:[#allocation10 + $0x600] ss:$40 sps:$4 sm:$0xff]  }
  0x75   :  { %1705 = vmatprep.subr.bf16.mxu1 %v2549_v62  ;;  %v2622_v62 = vld [vmem:[#allocation10 + $0xb4] ss:$40 sps:$4 sm:$0xff]  }
  0x77   :  { %1640 = vmatpush2.bf16.msra.mxu0 %v2550_v1  ;;  %v2620_v1 = vld [vmem:[#allocation10 + $0xb0] ss:$40 sps:$4 sm:$0xff]  }
  0x78   :  { %1706 = vmatpush1.bf16.msra.mxu1 %v2547_v63  ;;  %1641 = vmatprep.subr.bf16.mxu0 %v2551_v2  ;;  %v2661_v63 = vld [vmem:[#allocation10 + $0x5b4] ss:$40 sps:$4 sm:$0xff]   ;;  %v2659_v2 = vld [vmem:[#allocation10 + $0x5b0] ss:$40 sps:$4 sm:$0xff]  }
  0x79   :  { %1707 = vmatprep.subr.bf16.mxu1 %v2555_v3  ;;  %v2625_v3 = vld [vmem:[#allocation10 + $0x64] ss:$40 sps:$4 sm:$0xff]  }
  0x7b   :  { %1642 = vmatpush2.bf16.msra.mxu0 %v2556_v5  ;;  %v2623_v5 = vld [vmem:[#allocation10 + $0x60] ss:$40 sps:$4 sm:$0xff]  }
  0x7c   :  { %1708 = vmatpush1.bf16.msra.mxu1 %v2553_v4  ;;  %1734 = vmatprep.subr.bf16.mxu0 %v2562_v8  ;;  %v2667_v4 = vld [vmem:[#allocation10 + $0x564] ss:$40 sps:$4 sm:$0xff]   ;;  %v2673_v8 = vld [vmem:[#allocation10 + $0x514] ss:$40 sps:$4 sm:$0xff]  }
  0x7d   :  { %1709 = vmatprep.subr.bf16.mxu1 %v2559_v7  ;;  %v2628_v7 = vld [vmem:[#allocation10 + $0x14] ss:$40 sps:$4 sm:$0xff]  }
  0x7e   :  { %1644 = vmatmul.mubr.bf16.vlgmr.msra.gmra.mxu0 %v3095_v9 }
  0x7f   :  { %1735 = vmatpush1.bf16.msra.mxu0 %v2560_v11  ;;  %1766 = vmatprep.mubr.bf16.mxu0 %v3014_v0  ;;  %v2671_v11 = vld [vmem:[#allocation10 + $0x510] ss:$40 sps:$4 sm:$0xff]  }
  0x80   :  { %1710 = vmatpush2.bf16.msra.mxu1 %v2557_v10  ;;  %1736 = vmatprep.subr.bf16.mxu0 %v2568_v13  ;;  %v2626_v10 = vld [vmem:[#allocation10 + $0x10] ss:$40 sps:$4 sm:$0xff]   ;;  %v2632_v13 = vld [vmem:[#allocation10 + $0x4c0] ss:$40 sps:$4 sm:$0xff]  }
  0x81   :  { %1711 = vmatprep.subr.bf16.mxu1 %v2565_v12  ;;  %v2634_v12 = vld [vmem:[#allocation10 + $0x4c4] ss:$40 sps:$4 sm:$0xff]  }
  0x83   :  { %1737 = vmatpush1.bf16.msra.mxu0 %v2566_v15  ;;  %v2638_v15 = vld [vmem:[#allocation10 + $0x470] ss:$40 sps:$4 sm:$0xff]  }
  0x84   :  { %1712 = vmatpush2.bf16.msra.mxu1 %v2563_v14  ;;  %1738 = vmatprep.subr.bf16.mxu0 %v2574_v17  ;;  %v2640_v14 = vld [vmem:[#allocation10 + $0x474] ss:$40 sps:$4 sm:$0xff]  }
  0x85   :  { %1713 = vmatprep.subr.bf16.mxu1 %v2571_v16  ;;  %v2646_v16 = vld [vmem:[#allocation10 + $0x424] ss:$40 sps:$4 sm:$0xff]  }
  0x86   :  { %v2679_v17 = vld [vmem:[#allocation10 + $0x24c] ss:$40 sps:$4 sm:$0xff]  }
  0x87   :  { %1739 = vmatpush1.bf16.msra.mxu0 %v2572_v19  ;;  %v2644_v19 = vld [vmem:[#allocation10 + $0x420] ss:$40 sps:$4 sm:$0xff]  }
  0x88   :  { %1714 = vmatpush2.bf16.msra.mxu1 %v2569_v18  ;;  %1740 = vmatprep.subr.bf16.mxu0 %v2580_v21  ;;  %v2677_v18 = vld [vmem:[#allocation10 + $0x248] ss:$40 sps:$4 sm:$0xff]   ;;  %v2682_v21 = vld [vmem:[#allocation10 + $0x1fc] ss:$40 sps:$4 sm:$0xff]  }
  0x89   :  { %1715 = vmatprep.subr.bf16.mxu1 %v2577_v20  ;;  %v2652_v20 = vld [vmem:[#allocation10 + $0x3d4] ss:$40 sps:$4 sm:$0xff]  }
  0x8b   :  { %1741 = vmatpush1.bf16.msra.mxu0 %v2578_v23  ;;  %v2650_v23 = vld [vmem:[#allocation10 + $0x3d0] ss:$40 sps:$4 sm:$0xff]  }
  0x8c   :  { %1716 = vmatpush2.bf16.msra.mxu1 %v2575_v22  ;;  %1742 = vmatprep.subr.bf16.mxu0 %v2586_v25  ;;  %v2680_v22 = vld [vmem:[#allocation10 + $0x1f8] ss:$40 sps:$4 sm:$0xff]   ;;  %v2685_v25 = vld [vmem:[#allocation10 + $0x1ac] ss:$40 sps:$4 sm:$0xff]  }
  0x8d   :  { %1717 = vmatprep.subr.bf16.mxu1 %v2583_v24  ;;  %v2658_v24 = vld [vmem:[#allocation10 + $0x384] ss:$40 sps:$4 sm:$0xff]  }
  0x8f   :  { %1743 = vmatpush1.bf16.msra.mxu0 %v2584_v27  ;;  %v2656_v27 = vld [vmem:[#allocation10 + $0x380] ss:$40 sps:$4 sm:$0xff]  }
  0x90   :  { %1718 = vmatpush2.bf16.msra.mxu1 %v2581_v26  ;;  %1744 = vmatprep.subr.bf16.mxu0 %v2592_v29  ;;  %v2683_v26 = vld [vmem:[#allocation10 + $0x1a8] ss:$40 sps:$4 sm:$0xff]   ;;  %v2688_v29 = vld [vmem:[#allocation10 + $0x15c] ss:$40 sps:$4 sm:$0xff]  }
  0x91   :  { %1719 = vmatprep.subr.bf16.mxu1 %v2589_v28  ;;  %v2664_v28 = vld [vmem:[#allocation10 + $0x334] ss:$40 sps:$4 sm:$0xff]  }
  0x93   :  { %1745 = vmatpush1.bf16.msra.mxu0 %v2590_v31  ;;  %v2662_v31 = vld [vmem:[#allocation10 + $0x330] ss:$40 sps:$4 sm:$0xff]  }
  0x94   :  { %1720 = vmatpush2.bf16.msra.mxu1 %v2587_v30  ;;  %1746 = vmatprep.subr.bf16.mxu0 %v2598_v33  ;;  %v2686_v30 = vld [vmem:[#allocation10 + $0x158] ss:$40 sps:$4 sm:$0xff]   ;;  %v2691_v33 = vld [vmem:[#allocation10 + $0x10c] ss:$40 sps:$4 sm:$0xff]  }
  0x95   :  { %1721 = vmatprep.subr.bf16.mxu1 %v2595_v32  ;;  %v2670_v32 = vld [vmem:[#allocation10 + $0x2e4] ss:$40 sps:$4 sm:$0xff]  }
  0x97   :  { %1747 = vmatpush1.bf16.msra.mxu0 %v2596_v35  ;;  %v2668_v35 = vld [vmem:[#allocation10 + $0x2e0] ss:$40 sps:$4 sm:$0xff]  }
  0x98   :  { %1722 = vmatpush2.bf16.msra.mxu1 %v2593_v34  ;;  %1748 = vmatprep.subr.bf16.mxu0 %v2604_v37  ;;  %v2689_v34 = vld [vmem:[#allocation10 + $0x108] ss:$40 sps:$4 sm:$0xff]   ;;  %v2694_v37 = vld [vmem:[#allocation10 + $0xbc] ss:$40 sps:$4 sm:$0xff]  }
  0x99   :  { %1723 = vmatprep.subr.bf16.mxu1 %v2601_v36  ;;  %v2676_v36 = vld [vmem:[#allocation10 + $0x294] ss:$40 sps:$4 sm:$0xff]  }
  0x9b   :  { %1749 = vmatpush1.bf16.msra.mxu0 %v2602_v40  ;;  %v2674_v40 = vld [vmem:[#allocation10 + $0x290] ss:$40 sps:$4 sm:$0xff]  }
  0x9c   :  { %1724 = vmatpush2.bf16.msra.mxu1 %v2599_v39  ;;  %1775 = vmatprep.subr.bf16.mxu0 %v2607_v41  ;;  %v2692_v39 = vld [vmem:[#allocation10 + $0xb8] ss:$40 sps:$4 sm:$0xff]   ;;  %v2695_v41 = vld [vmem:[#allocation10 + $0x68] ss:$40 sps:$4 sm:$0xff]  }
  0x9d   :  { %1816 = vmatprep.subr.bf16.mxu1 %v2631_v42  ;;  %v2697_v42 = vld [vmem:[#allocation10 + $0x6c] ss:$40 sps:$4 sm:$0xff]  }
  0x9e   :  { %1767 = vmatmul.mubr.bf16.vlgmr.msra.gmra.mxu0 %v3088_v38 }
  0x9f   :  { %1726 = vmatmul.mubr.bf16.vlgmr.msra.gmra.mxu1 %v3095_v9  ;;  %1776 = vmatpush1.bf16.msra.mxu0 %v2605_v43  ;;  %v2700_v43 = vld [vmem:[#allocation10 + $0x1c] ss:$40 sps:$4 sm:$0xff]  }
  0xa0   :  { %1817 = vmatpush1.bf16.msra.mxu1 %v2629_v45  ;;  %1777 = vmatprep.subr.bf16.mxu0 %v2610_v44  ;;  %v2698_v44 = vld [vmem:[#allocation10 + $0x18] ss:$40 sps:$4 sm:$0xff]   ;;  %v2703_v45 = vld [vmem:[#allocation10 + $0x4cc] ss:$40 sps:$4 sm:$0xff]  }
  0xa1   :  { %1818 = vmatprep.subr.bf16.mxu1 %v2637_v46  ;;  %1848 = vmatprep.mubr.bf16.mxu1 %v3014_v0  ;;  %v2701_v46 = vld [vmem:[#allocation10 + $0x4c8] ss:$40 sps:$4 sm:$0xff]  }
  0xa2   :  { %1807 = vmatprep.mubr.bf16.mxu0 %v3091_v53 }
  0xa3   :  { %1778 = vmatpush1.bf16.msra.mxu0 %v2608_v47  ;;  %v2706_v47 = vld [vmem:[#allocation10 + $0x74c] ss:$40 sps:$4 sm:$0xff]  }
  0xa4   :  { %1819 = vmatpush1.bf16.msra.mxu1 %v2635_v48  ;;  %1779 = vmatprep.subr.bf16.mxu0 %v2613_v49  ;;  %v2704_v48 = vld [vmem:[#allocation10 + $0x748] ss:$40 sps:$4 sm:$0xff]   ;;  %v2709_v49 = vld [vmem:[#allocation10 + $0x47c] ss:$40 sps:$4 sm:$0xff]  }
  0xa5   :  { %1820 = vmatprep.subr.bf16.mxu1 %v2643_v50  ;;  %v2707_v50 = vld [vmem:[#allocation10 + $0x478] ss:$40 sps:$4 sm:$0xff]  }
  0xa7   :  { %1780 = vmatpush1.bf16.msra.mxu0 %v2611_v51  ;;  %v2712_v51 = vld [vmem:[#allocation10 + $0x6fc] ss:$40 sps:$4 sm:$0xff]  }
  0xa8   :  { %1821 = vmatpush1.bf16.msra.mxu1 %v2641_v52  ;;  %1781 = vmatprep.subr.bf16.mxu0 %v2616_v54  ;;  %v2710_v52 = vld [vmem:[#allocation10 + $0x6f8] ss:$40 sps:$4 sm:$0xff]   ;;  %v2715_v54 = vld [vmem:[#allocation10 + $0x42c] ss:$40 sps:$4 sm:$0xff]  }
  0xa9   :  { %1822 = vmatprep.subr.bf16.mxu1 %v2649_v55  ;;  %v2713_v55 = vld [vmem:[#allocation10 + $0x428] ss:$40 sps:$4 sm:$0xff]  }
  0xab   :  { %1782 = vmatpush1.bf16.msra.mxu0 %v2614_v56  ;;  %v2718_v56 = vld [vmem:[#allocation10 + $0x6ac] ss:$40 sps:$4 sm:$0xff]  }
  0xac   :  { %1823 = vmatpush1.bf16.msra.mxu1 %v2647_v57  ;;  %1783 = vmatprep.subr.bf16.mxu0 %v2619_v58  ;;  %v2716_v57 = vld [vmem:[#allocation10 + $0x6a8] ss:$40 sps:$4 sm:$0xff]   ;;  %v2721_v58 = vld [vmem:[#allocation10 + $0x3dc] ss:$40 sps:$4 sm:$0xff]  }
  0xad   :  { %1824 = vmatprep.subr.bf16.mxu1 %v2655_v59  ;;  %v2719_v59 = vld [vmem:[#allocation10 + $0x3d8] ss:$40 sps:$4 sm:$0xff]  }
  0xaf   :  { %1784 = vmatpush1.bf16.msra.mxu0 %v2617_v60  ;;  %v2724_v60 = vld [vmem:[#allocation10 + $0x65c] ss:$40 sps:$4 sm:$0xff]  }
  0xb0   :  { %1825 = vmatpush1.bf16.msra.mxu1 %v2653_v61  ;;  %1785 = vmatprep.subr.bf16.mxu0 %v2622_v62  ;;  %v2722_v61 = vld [vmem:[#allocation10 + $0x658] ss:$40 sps:$4 sm:$0xff]   ;;  %v2727_v62 = vld [vmem:[#allocation10 + $0x38c] ss:$40 sps:$4 sm:$0xff]  }
  0xb1   :  { %1826 = vmatprep.subr.bf16.mxu1 %v2661_v63  ;;  %v2725_v63 = vld [vmem:[#allocation10 + $0x388] ss:$40 sps:$4 sm:$0xff]  }
  0xb3   :  { %1786 = vmatpush1.bf16.msra.mxu0 %v2620_v1  ;;  %v2730_v1 = vld [vmem:[#allocation10 + $0x60c] ss:$40 sps:$4 sm:$0xff]  }
  0xb4   :  { %1827 = vmatpush1.bf16.msra.mxu1 %v2659_v2  ;;  %1787 = vmatprep.subr.bf16.mxu0 %v2625_v3  ;;  %v2728_v2 = vld [vmem:[#allocation10 + $0x608] ss:$40 sps:$4 sm:$0xff]   ;;  %v2733_v3 = vld [vmem:[#allocation10 + $0x33c] ss:$40 sps:$4 sm:$0xff]  }
  0xb5   :  { %1828 = vmatprep.subr.bf16.mxu1 %v2667_v4  ;;  %v2731_v4 = vld [vmem:[#allocation10 + $0x338] ss:$40 sps:$4 sm:$0xff]  }
  0xb7   :  { %1788 = vmatpush1.bf16.msra.mxu0 %v2623_v5  ;;  %v2736_v5 = vld [vmem:[#allocation10 + $0x5bc] ss:$40 sps:$4 sm:$0xff]  }
  0xb8   :  { %1829 = vmatpush1.bf16.msra.mxu1 %v2665_v6  ;;  %1789 = vmatprep.subr.bf16.mxu0 %v2628_v7  ;;  %v2734_v6 = vld [vmem:[#allocation10 + $0x5b8] ss:$40 sps:$4 sm:$0xff]   ;;  %v2737_v7 = vld [vmem:[#allocation10 + $0x2e8] ss:$40 sps:$4 sm:$0xff]  }
  0xb9   :  { %1830 = vmatprep.subr.bf16.mxu1 %v2673_v8  ;;  %v2739_v8 = vld [vmem:[#allocation10 + $0x2ec] ss:$40 sps:$4 sm:$0xff]  }
  0xbb   :  { %1790 = vmatpush1.bf16.msra.mxu0 %v2626_v10  ;;  %v2742_v10 = vld [vmem:[#allocation10 + $0x56c] ss:$40 sps:$4 sm:$0xff]  }
  0xbc   :  { %1831 = vmatpush1.bf16.msra.mxu1 %v2671_v11  ;;  %1791 = vmatprep.subr.bf16.mxu0 %v2634_v12  ;;  %v2740_v11 = vld [vmem:[#allocation10 + $0x568] ss:$40 sps:$4 sm:$0xff]   ;;  %v2745_v12 = vld [vmem:[#allocation10 + $0x29c] ss:$40 sps:$4 sm:$0xff]  }
  0xbd   :  { %1857 = vmatprep.subr.bf16.mxu1 %v2679_v17 }
  0xbf   :  { %1849 = vmatmul.mubr.bf16.vlgmr.msra.gmra.mxu1 %v3088_v38  ;;  %1792 = vmatpush2.bf16.msra.mxu0 %v2632_v13  ;;  %v2748_v13 = vld [vmem:[#allocation10 + $0x51c] ss:$40 sps:$4 sm:$0xff]  }
  0xc0   :  { %1889 = vmatprep.mubr.bf16.mxu1 %v3091_v53  ;;  %1793 = vmatprep.subr.bf16.mxu0 %v2640_v14  ;;  %v2743_v14 = vld [vmem:[#allocation10 + $0x298] ss:$40 sps:$4 sm:$0xff]  }
  0xc1   :  { %1858 = vmatpush1.bf16.msra.mxu1 %v2677_v18 }
  0xc2   :  { %1859 = vmatprep.subr.bf16.mxu1 %v2682_v21 }
  0xc3   :  { %1794 = vmatpush2.bf16.msra.mxu0 %v2638_v15  ;;  %v2746_v15 = vld [vmem:[#allocation10 + $0x518] ss:$40 sps:$4 sm:$0xff]  }
  0xc4   :  { %1795 = vmatprep.subr.bf16.mxu0 %v2646_v16 }
  0xc5   :  { %1860 = vmatpush1.bf16.msra.mxu1 %v2680_v22 }
  0xc6   :  { %1861 = vmatprep.subr.bf16.mxu1 %v2685_v25  ;;  %v2749_v25 = vld [vmem:[#allocation10 + $0x250] ss:$40 sps:$4 sm:$0xff]  }
  0xc7   :  { %1796 = vmatpush2.bf16.msra.mxu0 %v2644_v19 }
  0xc8   :  { %1797 = vmatprep.subr.bf16.mxu0 %v2652_v20  ;;  %v361_v20 = vlaneseq }
  0xc9   :  { %1862 = vmatpush1.bf16.msra.mxu1 %v2683_v26  ;;  %v2751_v26 = vld [vmem:[#allocation10 + $0x254] ss:$40 sps:$4 sm:$0xff]  }
  0xca   :  { %1863 = vmatprep.subr.bf16.mxu1 %v2688_v29  ;;  %v3111_v21 = vshrl.u32 %v361_v20, 7 }
  0xcb   :  { %1798 = vmatpush2.bf16.msra.mxu0 %v2650_v23  ;;  %v3116_v23 = vld [vmem:[#allocation12] sm:$0xff] }
  0xcc   :  { %1799 = vmatprep.subr.bf16.mxu0 %v2658_v24  ;;  %v3114_v22 = vsub.s32 0, %v3111_v21  ;;  %v3119_v24 = vsub.s32 1, %v3111_v21  ;;  %v375_v20 = vsub.s32 3, %v3111_v21 }
  0xcd   :  { %1864 = vmatpush1.bf16.msra.mxu1 %v2686_v30 }
  0xce   :  { %1865 = vmatprep.subr.bf16.mxu1 %v2691_v33 }
  0xcf   :  { %1800 = vmatpush2.bf16.msra.mxu0 %v2656_v27 }
  0xd0   :  { %1801 = vmatprep.subr.bf16.mxu0 %v2664_v28  ;;  %v2754_v28 = vld [vmem:[#allocation10 + $0x204] ss:$40 sps:$4 sm:$0xff]  }
  0xd1   :  { %1866 = vmatpush1.bf16.msra.mxu1 %v2689_v34  ;;  %v2757_v34 = vld [vmem:[#allocation10 + $0x1b4] ss:$40 sps:$4 sm:$0xff]  }
  0xd2   :  { %1867 = vmatprep.subr.bf16.mxu1 %v2694_v37  ;;  %v2776_v37 = vld [vmem:[#allocation10 + $0x750] ss:$40 sps:$4 sm:$0xff]  }
  0xd3   :  { %1802 = vmatpush2.bf16.msra.mxu0 %v2662_v31  ;;  %v2752_v31 = vld [vmem:[#allocation10 + $0x200] ss:$40 sps:$4 sm:$0xff]  }
  0xd4   :  { %1803 = vmatprep.subr.bf16.mxu0 %v2670_v32 }
  0xd5   :  { %1868 = vmatpush1.bf16.msra.mxu1 %v2692_v39  ;;  %v2778_v39 = vld [vmem:[#allocation10 + $0x754] ss:$40 sps:$4 sm:$0xff]  }
  0xd6   :  { %1869 = vmatprep.subr.bf16.mxu1 %v2697_v42  ;;  %v2760_v42 = vld [vmem:[#allocation10 + $0x164] ss:$40 sps:$4 sm:$0xff]  }
  0xd7   :  { %1804 = vmatpush2.bf16.msra.mxu0 %v2668_v35 }
  0xd8   :  { %1805 = vmatprep.subr.bf16.mxu0 %v2676_v36 }
  0xd9   :  { %1870 = vmatpush1.bf16.msra.mxu1 %v2695_v41  ;;  %v2755_v41 = vld [vmem:[#allocation10 + $0x1b0] ss:$40 sps:$4 sm:$0xff]  }
  0xda   :  { %1871 = vmatprep.subr.bf16.mxu1 %v2700_v43  ;;  %v2784_v43 = vld [vmem:[#allocation10 + $0x704] ss:$40 sps:$4 sm:$0xff]  }
  0xdb   :  { %1806 = vmatpush2.bf16.msra.mxu0 %v2674_v40 }
  0xdc   :  { %1898 = vmatprep.subr.bf16.mxu0 %v2706_v47  ;;  %v2763_v47 = vld [vmem:[#allocation10 + $0x114] ss:$40 sps:$4 sm:$0xff]  }
  0xdd   :  { %1872 = vmatpush1.bf16.msra.mxu1 %v2698_v44  ;;  %v2782_v44 = vld [vmem:[#allocation10 + $0x700] ss:$40 sps:$4 sm:$0xff]  }
  0xde   :  { %1808 = vmatmul.mubr.bf16.vlgmr.msra.gmra.mxu0 %v3095_v9  ;;  %1873 = vmatprep.subr.bf16.mxu1 %v2703_v45  ;;  %v2790_v45 = vld [vmem:[#allocation10 + $0x6b4] ss:$40 sps:$4 sm:$0xff]  }
  0xdf   :  { %1930 = vmatprep.mubr.bf16.mxu0 %v3014_v0  ;;  %1899 = vmatpush1.bf16.msra.mxu0 %v2704_v48  ;;  %v2788_v48 = vld [vmem:[#allocation10 + $0x6b0] ss:$40 sps:$4 sm:$0xff]  }
  0xe0   :  { %1900 = vmatprep.subr.bf16.mxu0 %v2712_v51  ;;  %v2766_v51 = vld [vmem:[#allocation10 + $0xc4] ss:$40 sps:$4 sm:$0xff]  }
  0xe1   :  { %1874 = vmatpush2.bf16.msra.mxu1 %v2701_v46  ;;  %v2758_v46 = vld [vmem:[#allocation10 + $0x160] ss:$40 sps:$4 sm:$0xff]  }
  0xe2   :  { %1875 = vmatprep.subr.bf16.mxu1 %v2709_v49  ;;  %v2796_v49 = vld [vmem:[#allocation10 + $0x664] ss:$40 sps:$4 sm:$0xff]  }
  0xe3   :  { %1901 = vmatpush1.bf16.msra.mxu0 %v2710_v52  ;;  %v2794_v52 = vld [vmem:[#allocation10 + $0x660] ss:$40 sps:$4 sm:$0xff]  }
  0xe4   :  { %1902 = vmatprep.subr.bf16.mxu0 %v2718_v56  ;;  %v2769_v56 = vld [vmem:[#allocation10 + $0x74] ss:$40 sps:$4 sm:$0xff]  }
  0xe5   :  { %1876 = vmatpush2.bf16.msra.mxu1 %v2707_v50  ;;  %v2761_v50 = vld [vmem:[#allocation10 + $0x110] ss:$40 sps:$4 sm:$0xff]  }
  0xe6   :  { %1877 = vmatprep.subr.bf16.mxu1 %v2715_v54  ;;  %v2802_v54 = vld [vmem:[#allocation10 + $0x614] ss:$40 sps:$4 sm:$0xff]  }
  0xe7   :  { %1903 = vmatpush1.bf16.msra.mxu0 %v2716_v57  ;;  %v2800_v57 = vld [vmem:[#allocation10 + $0x610] ss:$40 sps:$4 sm:$0xff]  }
  0xe8   :  { %1904 = vmatprep.subr.bf16.mxu0 %v2724_v60  ;;  %v2770_v60 = vld [vmem:[#allocation10 + $0x20] ss:$40 sps:$4 sm:$0xff]  }
  0xe9   :  { %1878 = vmatpush2.bf16.msra.mxu1 %v2713_v55  ;;  %v2764_v55 = vld [vmem:[#allocation10 + $0xc0] ss:$40 sps:$4 sm:$0xff]  }
  0xea   :  { %1879 = vmatprep.subr.bf16.mxu1 %v2721_v58  ;;  %v2767_v58 = vld [vmem:[#allocation10 + $0x70] ss:$40 sps:$4 sm:$0xff]  }
  0xeb   :  { %1905 = vmatpush1.bf16.msra.mxu0 %v2722_v61  ;;  %v2775_v61 = vld [vmem:[#allocation10 + $0x4d4] ss:$40 sps:$4 sm:$0xff]  }
  0xec   :  { %1906 = vmatprep.subr.bf16.mxu0 %v2730_v1 }
  0xed   :  { %1880 = vmatpush2.bf16.msra.mxu1 %v2719_v59  ;;  %v2772_v59 = vld [vmem:[#allocation10 + $0x24] ss:$40 sps:$4 sm:$0xff]  }
  0xee   :  { %1881 = vmatprep.subr.bf16.mxu1 %v2727_v62  ;;  %v2773_v62 = vld [vmem:[#allocation10 + $0x4d0] ss:$40 sps:$4 sm:$0xff]  }
  0xef   :  { %1907 = vmatpush1.bf16.msra.mxu0 %v2728_v2 }
  0xf0   :  { %1908 = vmatprep.subr.bf16.mxu0 %v2736_v5  ;;  %v2779_v5 = vld [vmem:[#allocation10 + $0x480] ss:$40 sps:$4 sm:$0xff]  }
  0xf1   :  { %1882 = vmatpush2.bf16.msra.mxu1 %v2725_v63  ;;  %v2781_v63 = vld [vmem:[#allocation10 + $0x484] ss:$40 sps:$4 sm:$0xff]  }
  0xf2   :  { %1883 = vmatprep.subr.bf16.mxu1 %v2733_v3 }
  0xf3   :  { %1909 = vmatpush1.bf16.msra.mxu0 %v2734_v6  ;;  %v2787_v6 = vld [vmem:[#allocation10 + $0x434] ss:$40 sps:$4 sm:$0xff]  }
  0xf4   :  { %1910 = vmatprep.subr.bf16.mxu0 %v2742_v10 }
  0xf5   :  { %1884 = vmatpush2.bf16.msra.mxu1 %v2731_v4 }
  0xf6   :  { %1885 = vmatprep.subr.bf16.mxu1 %v2739_v8 }
  0xf7   :  { %1911 = vmatpush1.bf16.msra.mxu0 %v2740_v11 }
  0xf8   :  { %1912 = vmatprep.subr.bf16.mxu0 %v2748_v13  ;;  %v2793_v13 = vld [vmem:[#allocation10 + $0x3e4] ss:$40 sps:$4 sm:$0xff]  }
  0xf9   :  { %1886 = vmatpush2.bf16.msra.mxu1 %v2737_v7 }
  0xfa   :  { %1887 = vmatprep.subr.bf16.mxu1 %v2745_v12  ;;  %v2785_v12 = vld [vmem:[#allocation10 + $0x430] ss:$40 sps:$4 sm:$0xff]  }
  0xfb   :  { %1913 = vmatpush1.bf16.msra.mxu0 %v2746_v15  ;;  %v2799_v15 = vld [vmem:[#allocation10 + $0x394] ss:$40 sps:$4 sm:$0xff]  }
  0xfc   :  { %1939 = vmatprep.subr.bf16.mxu0 %v2751_v26 }
  0xfd   :  { %1888 = vmatpush2.bf16.msra.mxu1 %v2743_v14  ;;  %v2791_v14 = vld [vmem:[#allocation10 + $0x3e0] ss:$40 sps:$4 sm:$0xff]  }
  0xfe   :  { %1931 = vmatmul.mubr.bf16.vlgmr.msra.gmra.mxu0 %v3088_v38  ;;  %1980 = vmatprep.subr.bf16.mxu1 %v2778_v39 }
  0xff   :  { %1971 = vmatprep.mubr.bf16.mxu0 %v3091_v53  ;;  %v368_v53 = vrot.slane %v3116_v23, %v3119_v24  ;;  %1940 = vmatpush1.bf16.msra.mxu0 %v2749_v25 }
 0x100   :  { %1890 = vmatmul.mubr.bf16.vlgmr.msra.gmra.mxu1 %v3095_v9  ;;  %1941 = vmatprep.subr.bf16.mxu0 %v2754_v28 }
 0x101   :  { %2012 = vmatprep.mubr.bf16.mxu1 %v3014_v0  ;;  %v364_v0 = vrot.slane %v3116_v23, %v3114_v22  ;;  %1981 = vmatpush1.bf16.msra.mxu1 %v2776_v37 }
 0x102   :  { %1982 = vmatprep.subr.bf16.mxu1 %v2784_v43 }
 0x103   :  { %1942 = vmatpush1.bf16.msra.mxu0 %v2752_v31 }
 0x104   :  { %1943 = vmatprep.subr.bf16.mxu0 %v2757_v34 }
 0x105   :  { %1983 = vmatpush1.bf16.msra.mxu1 %v2782_v44 }
 0x106   :  { %1984 = vmatprep.subr.bf16.mxu1 %v2790_v45 }
 0x107   :  { %1944 = vmatpush1.bf16.msra.mxu0 %v2755_v41 }
 0x108   :  { %1945 = vmatprep.subr.bf16.mxu0 %v2760_v42  ;;  %v383_v42 = vsub.s32 5, %v3111_v21 }
 0x109   :  { %1985 = vmatpush1.bf16.msra.mxu1 %v2788_v48 }
 0x10a   :  { %1986 = vmatprep.subr.bf16.mxu1 %v2796_v49  ;;  %v384_v48 = vrot.slane %v3116_v23, %v383_v42 }
 0x10b   :  { %1946 = vmatpush1.bf16.msra.mxu0 %v2758_v46 }
 0x10c   :  { %1947 = vmatprep.subr.bf16.mxu0 %v2763_v47 }
 0x10d   :  { %1987 = vmatpush1.bf16.msra.mxu1 %v2794_v52 }
 0x10e   :  { %1988 = vmatprep.subr.bf16.mxu1 %v2802_v54 }
 0x10f   :  { %1948 = vmatpush1.bf16.msra.mxu0 %v2761_v50 }
 0x110   :  { %1949 = vmatprep.subr.bf16.mxu0 %v2766_v51 }
 0x111   :  { %1989 = vmatpush1.bf16.msra.mxu1 %v2800_v57 }
 0x113   :  { %1950 = vmatpush1.bf16.msra.mxu0 %v2764_v55 }
 0x114   :  { %1951 = vmatprep.subr.bf16.mxu0 %v2769_v56 }
 0x117   :  { %1952 = vmatpush1.bf16.msra.mxu0 %v2767_v58 }
 0x118   :  { %1953 = vmatprep.subr.bf16.mxu0 %v2772_v59 }
 0x11b   :  { %1954 = vmatpush1.bf16.msra.mxu0 %v2770_v60 }
 0x11c   :  { %1955 = vmatprep.subr.bf16.mxu0 %v2775_v61 }
 0x11f   :  { %v1686_v16 = vpop.f32.mrf.mxu1  ;;  %1956 = vmatpush2.bf16.msra.mxu0 %v2773_v62 }
 0x120   :  { %1957 = vmatprep.subr.bf16.mxu0 %v2781_v63  ;;  %v105_v63 = vld [vmem:[#allocation9] sm:$0xff] }
 0x121   :  { %v1688_v17 = vpop.f32.mrf.mxu1 }
 0x123   :  { %v1690_v18 = vpop.f32.mrf.mxu1  ;;  %1958 = vmatpush2.bf16.msra.mxu0 %v2779_v5 }
 0x124   :  { %1959 = vmatprep.subr.bf16.mxu0 %v2787_v6  ;;  %v2803_v18 = vld [vmem:[#allocation10 + $0x340] ss:$40 sps:$4 sm:$0xff]  }
 0x125   :  { %v1691_v19 = vpop.f32.mrf.mxu1 }
 0x126   :  { %v371_v19 = vsub.s32 2, %v3111_v21 }
 0x127   :  { %1960 = vmatpush2.bf16.msra.mxu0 %v2785_v12 }
 0x128   :  { %1961 = vmatprep.subr.bf16.mxu0 %v2793_v13 }
 0x12b   :  { %1962 = vmatpush2.bf16.msra.mxu0 %v2791_v14 }
 0x12c   :  { %1963 = vmatprep.subr.bf16.mxu0 %v2799_v15  ;;  %v387_v15 = vsub.s32 6, %v3111_v21 }
 0x13e   :  { %v1645_v27 = vpop.f32.mrf.mxu0 }
 0x13f   :  { %v1646_v29 = vadd.f32 %v1645_v27, %v364_v0  ;;  %v372_v0 = vrot.slane %v3116_v23, %v371_v19 }
 0x140   :  { %v1647_v30 = vpop.f32.mrf.mxu0 }
 0x141   :  { %v3125_v32 = vadd.f32 %v1686_v16, %v1646_v29  ;;  %v1648_v33 = vadd.f32 %v1647_v30, %v368_v53  ;;  %v2797_v16 = vld [vmem:[#allocation10 + $0x390] ss:$40 sps:$4 sm:$0xff]   ;;  %v376_v53 = vrot.slane %v3116_v23, %v375_v20  ;;  %v2806_v20 = vld [vmem:[#allocation10 + $0x5c0] ss:$40 sps:$4 sm:$0xff]  }
 0x142   :  { %v1649_v35 = vpop.f32.mrf.mxu0  ;;  %1964 = vmatpush2.bf16.msra.mxu0 %v2797_v16  ;;  %v388_v16 = vrot.slane %v3116_v23, %v387_v15 }
 0x143   :  { %v3127_v36 = vadd.f32 %v1688_v17, %v1648_v33  ;;  %v2805_v17 = vld [vmem:[#allocation10 + $0x344] ss:$40 sps:$4 sm:$0xff]   ;;  %v2445_v34 = vmul.f32 -1.442695, %v3125_v32 }
 0x144   :  { %v1650_v40 = vpop.f32.mrf.mxu0  ;;  %1965 = vmatprep.subr.bf16.mxu0 %v2805_v17 }
 0x145   :  { %2821 = vpow2.f32 %v2445_v34  ;;  %v2446_v39 = vmul.f32 -1.442695, %v3127_v36  ;;  %v379_v40 = vsub.s32 4, %v3111_v21  ;;  %v2812_v34 = vld [vmem:[#allocation10 + $0x570] ss:$40 sps:$4 sm:$0xff]  }
 0x146   :  { %1966 = vmatpush2.bf16.msra.mxu0 %v2803_v18  ;;  %v2808_v18 = vld [vmem:[#allocation10 + $0x5c4] ss:$40 sps:$4 sm:$0xff]  }
 0x147   :  { %v380_v45 = vrot.slane %v3116_v23, %v379_v40  ;;  %1990 = vmatprep.subr.bf16.mxu1 %v2808_v18 }
 0x148   :  { %1991 = vmatpush1.bf16.msra.mxu1 %v2806_v20 }
 0x152   :  { %v2822_v41 = vpop.eup %2821 }
 0x153   :  { %v2027_v46 = vadd.f32 1.0, %v2822_v41  ;;  %v2815_v41 = vld [vmem:[#allocation10 + $0x2a0] ss:$40 sps:$4 sm:$0xff]  }
 0x15e   :  { %v1768_v2 = vpop.f32.mrf.mxu0 }
 0x15f   :  { %v1727_v1 = vpop.f32.mrf.mxu1 }
 0x160   :  { %v1770_v4 = vpop.f32.mrf.mxu0  ;;  %v1728_v27 = vadd.f32 %v1727_v1, %v372_v0  ;;  %v106_v1 = vld [vmem:[#allocation9 + $0x8] sm:$0xff] }
 0x161   :  { %v1729_v3 = vpop.f32.mrf.mxu1 }
 0x162   :  { %v1772_v7 = vpop.f32.mrf.mxu0  ;;  %v1730_v28 = vadd.f32 %v1729_v3, %v376_v53  ;;  %v1769_v31 = vadd.f32 %v1768_v2, %v1728_v27 }
 0x163   :  { %v1731_v8 = vpop.f32.mrf.mxu1 }
 0x164   :  { %v1773_v10 = vpop.f32.mrf.mxu0  ;;  %v1771_v33 = vadd.f32 %v1770_v4, %v1730_v28  ;;  %v2447_v35 = vmul.f32 -1.442695, %v1769_v31  ;;  %v2809_v28 = vld [vmem:[#allocation10 + $0x2f0] ss:$40 sps:$4 sm:$0xff]   ;;  %v2814_v31 = vld [vmem:[#allocation10 + $0x574] ss:$40 sps:$4 sm:$0xff]  }
 0x165   :  { %v1732_v11 = vpop.f32.mrf.mxu1  ;;  %1992 = vmatprep.subr.bf16.mxu1 %v2814_v31 }
 0x166   :  { %v2448_v37 = vmul.f32 -1.442695, %v1771_v33  ;;  %2823 = vpow2.f32 %v2447_v35  ;;  %1993 = vmatpush1.bf16.msra.mxu1 %v2812_v34 }
 0x168   :  { %2825 = vpow2.f32 %v2448_v37 }
 0x169   :  { %2827 = vpow2.f32 %v2446_v39  ;;  %v2817_v39 = vld [vmem:[#allocation10 + $0x2a4] ss:$40 sps:$4 sm:$0xff]  }
 0x16a   :  { %2829 = vrcp.f32 %v2027_v46 }
 0x173   :  { %v2824_v43 = vpop.eup %2823 }
 0x174   :  { %v2039_v32 = vadd.f32 1.0, %v2824_v43 }
 0x175   :  { %v2826_v44 = vpop.eup %2825 }
 0x176   :  { %v2828_v47 = vpop.eup %2827  ;;  %v2040_v49 = vadd.f32 1.0, %v2826_v44  ;;  %2831 = vrcp.f32 %v2039_v32  ;;  %v2818_v44 = vld [vmem:[#allocation10 + $0x520] ss:$40 sps:$4 sm:$0xff]  }
 0x177   :  { %v2028_v51 = vadd.f32 1.0, %v2828_v47  ;;  %v2830_v59 = vpop.eup %2829 }
 0x178   :  { %2833 = vrcp.f32 %v2040_v49 }
 0x17f   :  { %v1850_v25 = vpop.f32.mrf.mxu1 }
 0x181   :  { %v1852_v26 = vpop.f32.mrf.mxu1 }
 0x183   :  { %v1854_v29 = vpop.f32.mrf.mxu1  ;;  %v2832_v60 = vpop.eup %2831 }
 0x184   :  { %v2059_v5 = vmul.f32 %v2832_v60, %v105_v63 }
 0x185   :  { %v1855_v30 = vpop.f32.mrf.mxu1  ;;  %v2834_v61 = vpop.eup %2833 }
 0x186   :  { %v2060_v6 = vmul.f32 %v2834_v61, %v106_v1 }
 0x19e   :  { %v1809_v50 = vpop.f32.mrf.mxu0 }
 0x19f   :  { %v1810_v36 = vadd.f32 %v1809_v50, %v380_v45 }
 0x1a0   :  { %v1811_v52 = vpop.f32.mrf.mxu0 }
 0x1a1   :  { %v1851_v54 = vadd.f32 %v1850_v25, %v1810_v36  ;;  %v1812_v55 = vadd.f32 %v1811_v52, %v384_v48  ;;  %v2811_v25 = vld [vmem:[#allocation10 + $0x2f4] ss:$40 sps:$4 sm:$0xff]  }
 0x1a2   :  { %v1813_v56 = vpop.f32.mrf.mxu0  ;;  %1967 = vmatprep.subr.bf16.mxu0 %v2811_v25 }
 0x1a3   :  { %2835 = vtanh.f32 %v1851_v54  ;;  %v1853_v57 = vadd.f32 %v1852_v26, %v1812_v55  ;;  %v391_v26 = vsub.s32 7, %v3111_v21  ;;  %1968 = vmatpush2.bf16.msra.mxu0 %v2809_v28  ;;  %v2820_v21 = vld [vmem:[#allocation10 + $0x524] ss:$40 sps:$4 sm:$0xff]  }
 0x1a4   :  { %2837 = vrcp.f32 %v2028_v51  ;;  %v1814_v58 = vpop.f32.mrf.mxu0  ;;  %1969 = vmatprep.subr.bf16.mxu0 %v2817_v39  ;;  %1994 = vmatprep.subr.bf16.mxu1 %v2820_v21  ;;  %v2065_v51 = vld [vmem:[%s3190_s5] sm:$0x3]  ;;  %s3015_s5 = smov [#allocation14]  }
 0x1a5   :  { %2839 = vtanh.f32 %v1853_v57  ;;  %v392_v33 = vrot.slane %v3116_v23, %v391_v26  ;;  %1995 = vmatpush1.bf16.msra.mxu1 %v2818_v44  ;;  %v2089_v56 = vrot.slane %v2065_v51, %v3114_v22  ;;  %v2093_v57 = vrot.slane %v2065_v51, %v3119_v24 }
 0x1a7   :  { %1970 = vmatpush2.bf16.msra.mxu0 %v2815_v41 }
 0x1a8   :  { %2013 = vmatmul.mubr.bf16.vlgmr.msra.gmra.mxu1 %v3088_v38  ;;  %v2066_v38 = vld [vmem:[%s3191_s6] sm:$0x3]  ;;  %s2190_s6 = sshll.u32 %s3015_s5, 4  ;;  %s2191_s6 = int_to_ptr.vmem [resolvable:$true] %s2190_s6 }
 0x1a9   :  { %v2106_v63 = vrot.slane %v2066_v38, %v3119_v24  ;;  %s2957_s19 = scalar_lea.vmem %s2191_s6, 256  ;;  %p2962_p12 = scmp.lt.s32.totalorder %s2191_s6, %s2191_s6 }
 0x1aa   :  { %1972 = vmatmul.mubr.bf16.vlgmr.msra.gmra.mxu0 %v3095_v9  ;;  %p2958_p11 = scmp.ne.s32.totalorder %s2191_s6, %s2957_s19  ;;  %p2963_p13 = scmp.lt.s32.totalorder %s2957_s19, %s2957_s19 }
 0x1ac   :  { %p2964_p0 = por %p2963_p13, %p2962_p12 }
 0x1ae   :  { %p2965_p1 = pnand %p2964_p0, %p2958_p11 }
 0x1b0   :  { %v2836_v62 = vpop.eup %2835 }
 0x1b1   :  { %v2838_v2 = vpop.eup %2837  ;;  %v2061_v3 = vmul.f32 %v2836_v62, %v2830_v59  ;;  %v2102_v62 = vrot.slane %v2066_v38, %v3114_v22 }
 0x1b2   :  { %v2840_v4 = vpop.eup %2839 }
 0x1b3   :  { %v2062_v7 = vmul.f32 %v2840_v4, %v2838_v2  ;;  %v3139_v8 = vadd.f32 %v2061_v3, %v2059_v5 }
 0x1b5   :  { %v3141_v10 = vadd.f32 %v2062_v7, %v2060_v6  ;;  %v2071_v13 = vmul.f32 %v3139_v8, %v3139_v8 }
 0x1b7   :  { %v2067_v11 = vadd.f32 %v3141_v10, %v3139_v8  ;;  %v2072_v12 = vmul.f32 %v3141_v10, %v3141_v10 }
 0x1b9   :  { %2068 = vadd.xlane.f32.xlu0 %v2067_v11  ;;  %v2073_v14 = vadd.f32 %v2072_v12, %v2071_v13 }
 0x1bd   :  { %2074 = vadd.xlane.f32.xlu0 %v2073_v14 }
 0x1be   :  { %v1932_v53 = vpop.f32.mrf.mxu0 }
 0x1c0   :  { %v1891_v17 = vpop.f32.mrf.mxu1  ;;  %v1934_v30 = vpop.f32.mrf.mxu0 }
 0x1c1   :  { %v1892_v19 = vadd.f32 %v1891_v17, %v388_v16  ;;  %v358_v17 = vld [vmem:[#allocation12 + $0x8] sm:$0x3] }
 0x1c2   :  { %v1893_v0 = vpop.f32.mrf.mxu1  ;;  %v1936_v37 = vpop.f32.mrf.mxu0  ;;  %v396_v18 = vrot.slane %v358_v17, %v3114_v22 }
 0x1c3   :  { %v1933_v27 = vadd.f32 %v1932_v53, %v1892_v19  ;;  %v1894_v40 = vadd.f32 %v1893_v0, %v392_v33  ;;  %v400_v0 = vrot.slane %v358_v17, %v3119_v24 }
 0x1c4   :  { %v1895_v29 = vpop.f32.mrf.mxu1  ;;  %v1937_v42 = vpop.f32.mrf.mxu0 }
 0x1c5   :  { %v1935_v43 = vadd.f32 %v1934_v30, %v1894_v40  ;;  %v2449_v46 = vmul.f32 -1.442695, %v1933_v27 }
 0x1c6   :  { %v1896_v35 = vpop.f32.mrf.mxu1 }
 0x1c7   :  { %v2450_v49 = vmul.f32 -1.442695, %v1935_v43  ;;  %2841 = vpow2.f32 %v2449_v46 }
 0x1c9   :  { %2843 = vpow2.f32 %v2450_v49 }
 0x1d4   :  { %v2842_v52 = vpop.eup %2841 }
 0x1d5   :  { %v2053_v59 = vadd.f32 1.0, %v2842_v52 }
 0x1d6   :  { %v2844_v9 = vpop.eup %2843 }
 0x1d7   :  { %v2054_v1 = vadd.f32 1.0, %v2844_v9 }
 0x242   :  { %v2069_v23 = vpop.xlane.xlu0 %2068 }
 0x243   :  { %v2070_v45 = vmul.f32 0.00390625, %v2069_v23 }
 0x245   :  { %v2077_v32 = vmul.f32 %v2070_v45, %v2070_v45  ;;  %v2079_v54 = vsub.f32 %v3139_v8, %v2070_v45  ;;  %v2080_v55 = vsub.f32 %v3141_v10, %v2070_v45 }
 0x246   :  { %v2075_v47 = vpop.xlane.xlu0 %2074 }
 0x247   :  { %v2076_v48 = vmul.f32 0.00390625, %v2075_v47 }
 0x249   :  { %v2078_v50 = vsub.f32 %v2076_v48, %v2077_v32 }
 0x24b   :  { %v2081_v36 = vadd.f32 1e-05, %v2078_v50 }
 0x24d   :  { %2845 = vrsqrt.f32 %v2081_v36 }
 0x24e   :  { %2847 = vrcp.f32 %v2053_v59 }
 0x24f   :  { %2849 = vrcp.f32 %v2054_v1 }
 0x25a   :  { %v2846_v58 = vpop.eup %2845 }
 0x25b   :  { %v2083_v60 = vmul.f32 %v2846_v58, %v2079_v54  ;;  %v2084_v61 = vmul.f32 %v2846_v58, %v2080_v55  ;;  %v2848_v6 = vpop.eup %2847 }
 0x25c   :  { %v2850_v7 = vpop.eup %2849 }
 0x25d   :  { %v2096_v2 = vmul.f32 %v2089_v56, %v2083_v60  ;;  %v2097_v3 = vmul.f32 %v2093_v57, %v2084_v61 }
 0x25f   :  { %v2109_v4 = vadd.f32 %v2102_v62, %v2096_v2  ;;  %v2110_v5 = vadd.f32 %v2106_v63, %v2097_v3 }
 0x261   :  { %2851 = vtanh.f32 %v2109_v4  ;;  %2172 = vst [vmem:[#allocation14] sm:$0xff] %v2109_v4  ;;  %2173 = vst [vmem:[#allocation14 + $0x8] sm:$0xff] %v2110_v5 }
 0x262   :  { %2853 = vtanh.f32 %v2110_v5 }
 0x268   :  { %v2014_v25 = vpop.f32.mrf.mxu1 }
 0x26a   :  { %v1973_v19 = vpop.f32.mrf.mxu0  ;;  %v2016_v28 = vpop.f32.mrf.mxu1 }
 0x26b   :  { %v1974_v20 = vadd.f32 %v1973_v19, %v396_v18 }
 0x26c   :  { %v1975_v53 = vpop.f32.mrf.mxu0  ;;  %v2018_v31 = vpop.f32.mrf.mxu1 }
 0x26d   :  { %v2015_v26 = vadd.f32 %v2014_v25, %v1974_v20  ;;  %v1976_v29 = vadd.f32 %v1975_v53, %v400_v0 }
 0x26e   :  { %v2852_v8 = vpop.eup %2851  ;;  %v1977_v27 = vpop.f32.mrf.mxu0 }
 0x26f   :  { %v2854_v10 = vpop.eup %2853  ;;  %v2113_v11 = vmul.f32 %v2852_v8, %v2848_v6  ;;  %v2019_v33 = vpop.f32.mrf.mxu1  ;;  %v2017_v34 = vadd.f32 %v2016_v28, %v1976_v29 }
 0x270   :  { %v2114_v12 = vmul.f32 %v2854_v10, %v2850_v7  ;;  %v1978_v30 = vpop.f32.mrf.mxu0 }
 0x271   :  { %v2121_v14 = vmul.f32 %v2113_v11, %v2113_v11 }
 0x272   :  { %v2117_v13 = vadd.f32 %v2114_v12, %v2113_v11  ;;  %v2122_v15 = vmul.f32 %v2114_v12, %v2114_v12 }
 0x274   :  { %2118 = vadd.xlane.f32.xlu1 %v2117_v13  ;;  %v2123_v16 = vadd.f32 %v2122_v15, %v2121_v14 }
 0x278   :  { %2124 = vadd.xlane.f32.xlu1 %v2123_v16 }
 0x279   :  { %2968 = shalt.err (!%p2965_p1)
}
 0x27a   :  { %2193 = dma.vmem_to_hbm [thread:$0]  %s2191_s6, 256, %s3195_s10, [#allocation15]   ;;  %v2115_v43 = vld [vmem:[%s3192_s7] sm:$0x3] }
 0x27b   :  { %v2116_v44 = vld [vmem:[%s3193_s8] sm:$0x3]  ;;  %v2139_v46 = vrot.slane %v2115_v43, %v3114_v22  ;;  %v2143_v47 = vrot.slane %v2115_v43, %v3119_v24  ;;  %s3016_s7 = smov [#allocation13]  }
 0x27c   :  { %v2152_v49 = vrot.slane %v2116_v44, %v3114_v22  ;;  %v2156_v36 = vrot.slane %v2116_v44, %v3119_v24  ;;  %s2180_s10 = sshll.u32 %s3016_s7, 4  ;;  %s2181_s10 = int_to_ptr.vmem [resolvable:$true] %s2180_s10 }
 0x27d   :  { %s2977_s8 = scalar_lea.vmem %s2181_s10, 256  ;;  %p2982_p3 = scmp.lt.s32.totalorder %s2181_s10, %s2181_s10 }
 0x27e   :  { %p2978_p2 = scmp.ne.s32.totalorder %s2181_s10, %s2977_s8  ;;  %p2983_p4 = scmp.lt.s32.totalorder %s2977_s8, %s2977_s8 }
 0x280   :  { %p2984_p5 = por %p2983_p4, %p2982_p3 }
 0x282   :  { %p2985_p6 = pnand %p2984_p5, %p2978_p2 }
 0x2fd   :  { %v2119_v35 = vpop.xlane.xlu1 %2118 }
 0x2fe   :  { %v2120_v37 = vmul.f32 0.00390625, %v2119_v35 }
 0x300   :  { %v2127_v40 = vmul.f32 %v2120_v37, %v2120_v37  ;;  %v2129_v23 = vsub.f32 %v2113_v11, %v2120_v37  ;;  %v2130_v45 = vsub.f32 %v2114_v12, %v2120_v37 }
 0x301   :  { %v2125_v39 = vpop.xlane.xlu1 %2124 }
 0x302   :  { %v2126_v41 = vmul.f32 0.00390625, %v2125_v39 }
 0x304   :  { %v2128_v42 = vsub.f32 %v2126_v41, %v2127_v40 }
 0x306   :  { %v2131_v21 = vadd.f32 1e-05, %v2128_v42 }
 0x308   :  { %2855 = vrsqrt.f32 %v2131_v21 }
 0x315   :  { %v2856_v32 = vpop.eup %2855 }
 0x316   :  { %v2133_v48 = vmul.f32 %v2856_v32, %v2129_v23  ;;  %v2134_v50 = vmul.f32 %v2856_v32, %v2130_v45 }
 0x318   :  { %v2146_v51 = vmul.f32 %v2139_v46, %v2133_v48  ;;  %v2147_v52 = vmul.f32 %v2143_v47, %v2134_v50 }
 0x31a   :  { %v2159_v38 = vadd.f32 %v2152_v49, %v2146_v51  ;;  %v2160_v9 = vadd.f32 %v2156_v36, %v2147_v52 }
 0x31c   :  { %v2161_v54 = vadd.f32 %v2159_v38, %v2015_v26  ;;  %v2162_v55 = vadd.f32 %v2160_v9, %v2017_v34 }
 0x31e   :  { %2167 = vst [vmem:[#allocation13] sm:$0xff] %v2161_v54  ;;  %2168 = vst [vmem:[#allocation13 + $0x8] sm:$0xff] %v2162_v55 }
 0x31f   :  { %2988 = shalt.err (!%p2985_p6)
}
 0x320   :  { %2183 = dma.vmem_to_hbm [thread:$0]  %s2181_s10, 256, %s3194_s9, [#allocation6]  }
 0x321   :  { %3003 = dma.done.wait [#allocation6], 256  }
 0x322   :  { %3004 = vsyncadd [#allocation6], 4294967040 }
 0x323   :  { %3005 = dma.done.wait [#allocation15], 256  }
 0x324   :  { %3006 = vsyncadd [#allocation15], 4294967040 }
 0x325   :  { %2200 = vsyncpa [#allocation5], 1 }
 0x326   :  { %2201 = vsyncpa [#allocation8], 1 }
 0x327   :  { %2202 = vsyncpa [#allocation11], 1 }
 0x328   :  { %2203 = vsyncpa [#allocation6], 1 }
 0x329   :  { %2204 = vsyncpa [#allocation15], 1 }

</bundles_post_ra>
